<compile_context>
chip_gen: v5e
topology: v5e:2x2
jax: 0.10.0
libtpu: 0.0.40
codegen_flags: <defaults>
</compile_context>

<pallas_src>
import jax
import jax.numpy as jnp
from jax import lax
from jax.experimental import pallas as pl
from jax.experimental.pallas import tpu as pltpu


# Fully unroll the log-depth tree/scan only while vreg pressure stays sane
# (each live (6,6) f32 occupies one padded (8,128) vreg; 64 vregs total).
_TREE_MAX = 16


# ---------------------------------------------------------------------------
# VPU helpers: 6x6 products as broadcast multiply-adds with tree-added terms
# ---------------------------------------------------------------------------
def _vpu_mm(a, b):
    """a @ b for (6,6) operands: 6 outer-product madds, depth-3 tree add."""
    t = [a[:, k:k + 1] * b[k:k + 1, :] for k in range(6)]
    return ((t[0] + t[1]) + (t[2] + t[3])) + (t[4] + t[5])


def _vpu_mm_rows(a, b_rows):
    """a @ b where b is given as 6 pre-broadcast (6,6) row replicas."""
    t = [a[:, k:k + 1] * b_rows[k] for k in range(6)]
    return ((t[0] + t[1]) + (t[2] + t[3])) + (t[4] + t[5])


def _sandwich(M, MT, R_rows):
    """M @ R @ M^T with R supplied as hoisted row broadcasts, M^T explicit."""
    A = _vpu_mm_rows(M, R_rows)        # M @ R
    return _vpu_mm(A, MT)              # (M @ R) @ M^T


def _r_rows(R):
    # Hoist the 6 sublane-broadcast rows of R once (reused by every sandwich).
    return [jnp.broadcast_to(R[k:k + 1, :], (6, 6)) for k in range(6)]


# ---------------------------------------------------------------------------
# kernels
# ---------------------------------------------------------------------------
def _accel_last_kernel(e_ref, et_ref, r_ref, out_ref):
    """full=True: log-depth product of (M, M^T); single sandwich at the end."""
    n = e_ref.shape[0]
    R = r_ref[...]

    if n == 0:
        out_ref[...] = R
        return

    if n <= _TREE_MAX:
        # Binary tree reduction over contiguous element ranges.
        # pairs[j] = (prod E over range_j, prod E^T over range_j (reversed)).
        pairs = [(e_ref[i], et_ref[i]) for i in range(n)]
        while len(pairs) > 1:
            nxt = []
            for j in range(0, len(pairs) - 1, 2):
                p_lo, q_lo = pairs[j]          # lower-index range
                p_hi, q_hi = pairs[j + 1]      # higher-index range
                nxt.append((_vpu_mm(p_hi, p_lo), _vpu_mm(q_lo, q_hi)))
            if len(pairs) % 2 == 1:
                nxt.append(pairs[-1])
            pairs = nxt
        M, MT = pairs[0]
    else:
        def body(i, carry):
            M, MT = carry
            return (_vpu_mm(e_ref[i], M), _vpu_mm(MT, et_ref[i]))

        M, MT = lax.fori_loop(1, n, body, (e_ref[0], et_ref[0]), unroll=8)

    out_ref[...] = _sandwich(M, MT, _r_rows(R))


def _accel_all_kernel(e_ref, et_ref, r_ref, out_ref):
    """full=False: prefix scan of (M_k, M_k^T); sandwiches written directly."""
    n = e_ref.shape[0]
    R = r_ref[...]
    R_rows = _r_rows(R)

    # M_0 = I  =>  R_f[0] = R  (identity sandwich is a no-op).
    out_ref[0] = R

    if n == 0:
        return

    if n <= _TREE_MAX:
        # Hillis-Steele inclusive prefix scan (log2(n) dependent levels).
        # P[i] -> E_i @ ... @ E_0 ; Q[i] -> E_0^T @ ... @ E_i^T = P[i]^T.
        P = [e_ref[i] for i in range(n)]
        Q = [et_ref[i] for i in range(n)]
        offset = 1
        while offset < n:
            newP = list(P)
            newQ = list(Q)
            for i in range(offset, n):
                newP[i] = _vpu_mm(P[i], P[i - offset])
                newQ[i] = _vpu_mm(Q[i - offset], Q[i])
            P, Q = newP, newQ
            offset *= 2

        # Independent sandwiches -- no carried dependency, no staging buffer.
        for i in range(n):
            out_ref[i + 1] = _sandwich(P[i], Q[i], R_rows)
    else:
        # Linear chain fallback with the sandwich fused into the loop body
        # (no out_ref staging round-trip).
        M0, MT0 = e_ref[0], et_ref[0]
        out_ref[1] = _sandwich(M0, MT0, R_rows)

        def body(i, carry):
            M, MT = carry
            M = _vpu_mm(e_ref[i], M)
            MT = _vpu_mm(MT, et_ref[i])
            out_ref[i + 1] = _sandwich(M, MT, R_rows)
            return (M, MT)

        lax.fori_loop(1, n, body, (M0, MT0), unroll=8)


# ---------------------------------------------------------------------------
# wrapper
# ---------------------------------------------------------------------------
def torch_accelerator_forward(element_matrices, R, full=True):
    """JAX/Pallas equivalent of the accelerator forward pass.

    element_matrices : (n, 6, 6) stacked element transfer matrices
    R                : (6, 6) initial beam matrix
    full=True  -> final beam matrix (6, 6)
    full=False -> beam matrix after every element (n+1, 6, 6)
    """
    E = element_matrices.astype(jnp.float32)
    ET = jnp.swapaxes(E, -1, -2)     # host-side transpose: avoids in-kernel XLU transposes
    R = R.astype(jnp.float32)
    n = E.shape[0]

    in_specs = [
        pl.BlockSpec((n, 6, 6), lambda i: (0, 0, 0)),
        pl.BlockSpec((n, 6, 6), lambda i: (0, 0, 0)),
        pl.BlockSpec((6, 6), lambda i: (0, 0)),
    ]
    params = pltpu.CompilerParams(dimension_semantics=("arbitrary",))

    if full:
        return pl.pallas_call(
            _accel_last_kernel,
            out_shape=jax.ShapeDtypeStruct((6, 6), jnp.float32),
            grid=(1,),
            in_specs=in_specs,
            out_specs=pl.BlockSpec((6, 6), lambda i: (0, 0)),
            compiler_params=params,
        )(E, ET, R)

    return pl.pallas_call(
        _accel_all_kernel,
        out_shape=jax.ShapeDtypeStruct((n + 1, 6, 6), jnp.float32),
        grid=(1,),
        in_specs=in_specs,
        out_specs=pl.BlockSpec((n + 1, 6, 6), lambda i: (0, 0, 0)),
        compiler_params=params,
    )(E, ET, R)


# ---------------------------------------------------------------------------
# Element builders (drift_matrix == TorchDrift.forward) and pure-JAX reference
# ---------------------------------------------------------------------------
def drift_matrix(L):
    """Exactly TorchDrift.forward(): eye(6) with M[0,1]=L, M[2,3]=L."""
    M = jnp.eye(6, dtype=jnp.float32)
    return M.at[0, 1].set(L).at[2, 3].set(L)


def thin_quad_matrix(kappa):
    M = jnp.eye(6, dtype=jnp.float32)
    return M.at[1, 0].set(-kappa).at[3, 2].set(kappa)


def reference_forward(E, R, full=True):
    """Pure-JAX reference mirroring the torch module."""
    Ms = [jnp.eye(6, dtype=jnp.float32)]
    for i in range(E.shape[0]):
        Ms.append(E[i] @ Ms[-1])
    M = jnp.stack(Ms, axis=0)
    Rf = jnp.matmul(M, jnp.matmul(R, jnp.swapaxes(M, -2, -1)))
    return Rf[-1] if full else Rf


if __name__ == "__main__":
    key = jax.random.PRNGKey(0)

    # Beamline: 4 (thin-quad, drift) pairs = 8 elements, deterministic params.
    elements = []
    for j in range(4):
        elements.append(thin_quad_matrix(0.1 * (j + 1) * (-1.0) ** j))
        elements.append(drift_matrix(0.25 + 0.05 * j))
    E = jnp.stack(elements, axis=0)  # (8, 6, 6)

    # Deterministic symmetric positive-definite initial beam matrix R (6, 6)
    A = jax.random.normal(key, (6, 6), dtype=jnp.float32)
    R = A @ A.T + 1e-2 * jnp.eye(6, dtype=jnp.float32)

    # full=True path (default): final beam matrix only
    Rf_last = torch_accelerator_forward(E, R, full=True)
    jax.block_until_ready(Rf_last)

    # full=False path: beam matrix after every element
    Rf_all = torch_accelerator_forward(E, R, full=False)
    jax.block_until_ready(Rf_all)

    # correctness check vs pure-JAX reference
    ref_last = reference_forward(E, R, full=True)
    ref_all = reference_forward(E, R, full=False)
    assert Rf_last.shape == (6, 6)
    assert Rf_all.shape == (E.shape[0] + 1, 6, 6)
    assert jnp.allclose(Rf_last, ref_last, atol=1e-4, rtol=1e-4)
    assert jnp.allclose(Rf_all, ref_all, atol=1e-4, rtol=1e-4)
    assert jnp.allclose(Rf_all[-1], Rf_last, atol=1e-5, rtol=1e-5)

    print("KERNEL_OK")
</pallas_src>

<mosaic_0001>
module attributes {stable_mosaic.version = 11 : i64} {
  func.func @_accel_last_kernel(%arg0: i32, %arg1: memref<8x6x6xf32, #tpu.memory_space<vmem>>, %arg2: memref<8x6x6xf32, #tpu.memory_space<vmem>>, %arg3: memref<6x6xf32, #tpu.memory_space<vmem>>, %arg4: memref<6x6xf32, #tpu.memory_space<vmem>>) attributes {dimension_semantics = [#tpu.dimension_semantics<arbitrary>], iteration_bounds = array<i64: 1>, scalar_prefetch = 0 : i64, scratch_operands = 0 : i64, tpu.core_type = #tpu.core_type<tc>, window_params = [{pipeline_mode = #tpu.pipeline_mode<synchronous>, transform_indices = @transform_0, window_bounds = array<i64: 8, 6, 6>}, {pipeline_mode = #tpu.pipeline_mode<synchronous>, transform_indices = @transform_1, window_bounds = array<i64: 8, 6, 6>}, {pipeline_mode = #tpu.pipeline_mode<synchronous>, transform_indices = @transform_2, window_bounds = array<i64: 6, 6>}, {pipeline_mode = #tpu.pipeline_mode<synchronous>, transform_indices = @transform_3, window_bounds = array<i64: 6, 6>}]} {
    %c0 = arith.constant 0 : index
    %c0_0 = arith.constant 0 : index
    %0 = vector.load %arg3[%c0, %c0_0] : memref<6x6xf32, #tpu.memory_space<vmem>>, vector<6x6xf32>
    %c0_1 = arith.constant 0 : index
    %c0_2 = arith.constant 0 : index
    %c0_3 = arith.constant 0 : index
    %1 = vector.load %arg1[%c0_1, %c0_2, %c0_3] : memref<8x6x6xf32, #tpu.memory_space<vmem>>, vector<1x6x6xf32>
    %2 = vector.shape_cast %1 : vector<1x6x6xf32> to vector<6x6xf32>
    %c0_4 = arith.constant 0 : index
    %c0_5 = arith.constant 0 : index
    %c0_6 = arith.constant 0 : index
    %3 = vector.load %arg2[%c0_4, %c0_5, %c0_6] : memref<8x6x6xf32, #tpu.memory_space<vmem>>, vector<1x6x6xf32>
    %4 = vector.shape_cast %3 : vector<1x6x6xf32> to vector<6x6xf32>
    %c1 = arith.constant 1 : index
    %c0_7 = arith.constant 0 : index
    %c0_8 = arith.constant 0 : index
    %5 = vector.load %arg1[%c1, %c0_7, %c0_8] : memref<8x6x6xf32, #tpu.memory_space<vmem>>, vector<1x6x6xf32>
    %6 = vector.shape_cast %5 : vector<1x6x6xf32> to vector<6x6xf32>
    %c1_9 = arith.constant 1 : index
    %c0_10 = arith.constant 0 : index
    %c0_11 = arith.constant 0 : index
    %7 = vector.load %arg2[%c1_9, %c0_10, %c0_11] : memref<8x6x6xf32, #tpu.memory_space<vmem>>, vector<1x6x6xf32>
    %8 = vector.shape_cast %7 : vector<1x6x6xf32> to vector<6x6xf32>
    %c2 = arith.constant 2 : index
    %c0_12 = arith.constant 0 : index
    %c0_13 = arith.constant 0 : index
    %9 = vector.load %arg1[%c2, %c0_12, %c0_13] : memref<8x6x6xf32, #tpu.memory_space<vmem>>, vector<1x6x6xf32>
    %10 = vector.shape_cast %9 : vector<1x6x6xf32> to vector<6x6xf32>
    %c2_14 = arith.constant 2 : index
    %c0_15 = arith.constant 0 : index
    %c0_16 = arith.constant 0 : index
    %11 = vector.load %arg2[%c2_14, %c0_15, %c0_16] : memref<8x6x6xf32, #tpu.memory_space<vmem>>, vector<1x6x6xf32>
    %12 = vector.shape_cast %11 : vector<1x6x6xf32> to vector<6x6xf32>
    %c3 = arith.constant 3 : index
    %c0_17 = arith.constant 0 : index
    %c0_18 = arith.constant 0 : index
    %13 = vector.load %arg1[%c3, %c0_17, %c0_18] : memref<8x6x6xf32, #tpu.memory_space<vmem>>, vector<1x6x6xf32>
    %14 = vector.shape_cast %13 : vector<1x6x6xf32> to vector<6x6xf32>
    %c3_19 = arith.constant 3 : index
    %c0_20 = arith.constant 0 : index
    %c0_21 = arith.constant 0 : index
    %15 = vector.load %arg2[%c3_19, %c0_20, %c0_21] : memref<8x6x6xf32, #tpu.memory_space<vmem>>, vector<1x6x6xf32>
    %16 = vector.shape_cast %15 : vector<1x6x6xf32> to vector<6x6xf32>
    %c4 = arith.constant 4 : index
    %c0_22 = arith.constant 0 : index
    %c0_23 = arith.constant 0 : index
    %17 = vector.load %arg1[%c4, %c0_22, %c0_23] : memref<8x6x6xf32, #tpu.memory_space<vmem>>, vector<1x6x6xf32>
    %18 = vector.shape_cast %17 : vector<1x6x6xf32> to vector<6x6xf32>
    %c4_24 = arith.constant 4 : index
    %c0_25 = arith.constant 0 : index
    %c0_26 = arith.constant 0 : index
    %19 = vector.load %arg2[%c4_24, %c0_25, %c0_26] : memref<8x6x6xf32, #tpu.memory_space<vmem>>, vector<1x6x6xf32>
    %20 = vector.shape_cast %19 : vector<1x6x6xf32> to vector<6x6xf32>
    %c5 = arith.constant 5 : index
    %c0_27 = arith.constant 0 : index
    %c0_28 = arith.constant 0 : index
    %21 = vector.load %arg1[%c5, %c0_27, %c0_28] : memref<8x6x6xf32, #tpu.memory_space<vmem>>, vector<1x6x6xf32>
    %22 = vector.shape_cast %21 : vector<1x6x6xf32> to vector<6x6xf32>
    %c5_29 = arith.constant 5 : index
    %c0_30 = arith.constant 0 : index
    %c0_31 = arith.constant 0 : index
    %23 = vector.load %arg2[%c5_29, %c0_30, %c0_31] : memref<8x6x6xf32, #tpu.memory_space<vmem>>, vector<1x6x6xf32>
    %24 = vector.shape_cast %23 : vector<1x6x6xf32> to vector<6x6xf32>
    %c6 = arith.constant 6 : index
    %c0_32 = arith.constant 0 : index
    %c0_33 = arith.constant 0 : index
    %25 = vector.load %arg1[%c6, %c0_32, %c0_33] : memref<8x6x6xf32, #tpu.memory_space<vmem>>, vector<1x6x6xf32>
    %26 = vector.shape_cast %25 : vector<1x6x6xf32> to vector<6x6xf32>
    %c6_34 = arith.constant 6 : index
    %c0_35 = arith.constant 0 : index
    %c0_36 = arith.constant 0 : index
    %27 = vector.load %arg2[%c6_34, %c0_35, %c0_36] : memref<8x6x6xf32, #tpu.memory_space<vmem>>, vector<1x6x6xf32>
    %28 = vector.shape_cast %27 : vector<1x6x6xf32> to vector<6x6xf32>
    %c7 = arith.constant 7 : index
    %c0_37 = arith.constant 0 : index
    %c0_38 = arith.constant 0 : index
    %29 = vector.load %arg1[%c7, %c0_37, %c0_38] : memref<8x6x6xf32, #tpu.memory_space<vmem>>, vector<1x6x6xf32>
    %30 = vector.shape_cast %29 : vector<1x6x6xf32> to vector<6x6xf32>
    %c7_39 = arith.constant 7 : index
    %c0_40 = arith.constant 0 : index
    %c0_41 = arith.constant 0 : index
    %31 = vector.load %arg2[%c7_39, %c0_40, %c0_41] : memref<8x6x6xf32, #tpu.memory_space<vmem>>, vector<1x6x6xf32>
    %32 = vector.shape_cast %31 : vector<1x6x6xf32> to vector<6x6xf32>
    %33 = vector.extract_strided_slice %6 {offsets = [0, 0], sizes = [6, 1], strides = [1, 1]} : vector<6x6xf32> to vector<6x1xf32>
    %34 = vector.extract_strided_slice %2 {offsets = [0, 0], sizes = [1, 6], strides = [1, 1]} : vector<6x6xf32> to vector<1x6xf32>
    %35 = vector.broadcast %33 : vector<6x1xf32> to vector<6x6xf32>
    %36 = vector.broadcast %34 : vector<1x6xf32> to vector<6x6xf32>
    %37 = arith.mulf %35, %36 : vector<6x6xf32>
    %38 = vector.extract_strided_slice %6 {offsets = [0, 1], sizes = [6, 1], strides = [1, 1]} : vector<6x6xf32> to vector<6x1xf32>
    %39 = vector.extract_strided_slice %2 {offsets = [1, 0], sizes = [1, 6], strides = [1, 1]} : vector<6x6xf32> to vector<1x6xf32>
    %40 = vector.broadcast %38 : vector<6x1xf32> to vector<6x6xf32>
    %41 = vector.broadcast %39 : vector<1x6xf32> to vector<6x6xf32>
    %42 = arith.mulf %40, %41 : vector<6x6xf32>
    %43 = vector.extract_strided_slice %6 {offsets = [0, 2], sizes = [6, 1], strides = [1, 1]} : vector<6x6xf32> to vector<6x1xf32>
    %44 = vector.extract_strided_slice %2 {offsets = [2, 0], sizes = [1, 6], strides = [1, 1]} : vector<6x6xf32> to vector<1x6xf32>
    %45 = vector.broadcast %43 : vector<6x1xf32> to vector<6x6xf32>
    %46 = vector.broadcast %44 : vector<1x6xf32> to vector<6x6xf32>
    %47 = arith.mulf %45, %46 : vector<6x6xf32>
    %48 = vector.extract_strided_slice %6 {offsets = [0, 3], sizes = [6, 1], strides = [1, 1]} : vector<6x6xf32> to vector<6x1xf32>
    %49 = vector.extract_strided_slice %2 {offsets = [3, 0], sizes = [1, 6], strides = [1, 1]} : vector<6x6xf32> to vector<1x6xf32>
    %50 = vector.broadcast %48 : vector<6x1xf32> to vector<6x6xf32>
    %51 = vector.broadcast %49 : vector<1x6xf32> to vector<6x6xf32>
    %52 = arith.mulf %50, %51 : vector<6x6xf32>
    %53 = vector.extract_strided_slice %6 {offsets = [0, 4], sizes = [6, 1], strides = [1, 1]} : vector<6x6xf32> to vector<6x1xf32>
    %54 = vector.extract_strided_slice %2 {offsets = [4, 0], sizes = [1, 6], strides = [1, 1]} : vector<6x6xf32> to vector<1x6xf32>
    %55 = vector.broadcast %53 : vector<6x1xf32> to vector<6x6xf32>
    %56 = vector.broadcast %54 : vector<1x6xf32> to vector<6x6xf32>
    %57 = arith.mulf %55, %56 : vector<6x6xf32>
    %58 = vector.extract_strided_slice %6 {offsets = [0, 5], sizes = [6, 1], strides = [1, 1]} : vector<6x6xf32> to vector<6x1xf32>
    %59 = vector.extract_strided_slice %2 {offsets = [5, 0], sizes = [1, 6], strides = [1, 1]} : vector<6x6xf32> to vector<1x6xf32>
    %60 = vector.broadcast %58 : vector<6x1xf32> to vector<6x6xf32>
    %61 = vector.broadcast %59 : vector<1x6xf32> to vector<6x6xf32>
    %62 = arith.mulf %60, %61 : vector<6x6xf32>
    %63 = arith.addf %37, %42 : vector<6x6xf32>
    %64 = arith.addf %47, %52 : vector<6x6xf32>
    %65 = arith.addf %63, %64 : vector<6x6xf32>
    %66 = arith.addf %57, %62 : vector<6x6xf32>
    %67 = arith.addf %65, %66 : vector<6x6xf32>
    %68 = vector.extract_strided_slice %4 {offsets = [0, 0], sizes = [6, 1], strides = [1, 1]} : vector<6x6xf32> to vector<6x1xf32>
    %69 = vector.extract_strided_slice %8 {offsets = [0, 0], sizes = [1, 6], strides = [1, 1]} : vector<6x6xf32> to vector<1x6xf32>
    %70 = vector.broadcast %68 : vector<6x1xf32> to vector<6x6xf32>
    %71 = vector.broadcast %69 : vector<1x6xf32> to vector<6x6xf32>
    %72 = arith.mulf %70, %71 : vector<6x6xf32>
    %73 = vector.extract_strided_slice %4 {offsets = [0, 1], sizes = [6, 1], strides = [1, 1]} : vector<6x6xf32> to vector<6x1xf32>
    %74 = vector.extract_strided_slice %8 {offsets = [1, 0], sizes = [1, 6], strides = [1, 1]} : vector<6x6xf32> to vector<1x6xf32>
    %75 = vector.broadcast %73 : vector<6x1xf32> to vector<6x6xf32>
    %76 = vector.broadcast %74 : vector<1x6xf32> to vector<6x6xf32>
    %77 = arith.mulf %75, %76 : vector<6x6xf32>
    %78 = vector.extract_strided_slice %4 {offsets = [0, 2], sizes = [6, 1], strides = [1, 1]} : vector<6x6xf32> to vector<6x1xf32>
    %79 = vector.extract_strided_slice %8 {offsets = [2, 0], sizes = [1, 6], strides = [1, 1]} : vector<6x6xf32> to vector<1x6xf32>
    %80 = vector.broadcast %78 : vector<6x1xf32> to vector<6x6xf32>
    %81 = vector.broadcast %79 : vector<1x6xf32> to vector<6x6xf32>
    %82 = arith.mulf %80, %81 : vector<6x6xf32>
    %83 = vector.extract_strided_slice %4 {offsets = [0, 3], sizes = [6, 1], strides = [1, 1]} : vector<6x6xf32> to vector<6x1xf32>
    %84 = vector.extract_strided_slice %8 {offsets = [3, 0], sizes = [1, 6], strides = [1, 1]} : vector<6x6xf32> to vector<1x6xf32>
    %85 = vector.broadcast %83 : vector<6x1xf32> to vector<6x6xf32>
    %86 = vector.broadcast %84 : vector<1x6xf32> to vector<6x6xf32>
    %87 = arith.mulf %85, %86 : vector<6x6xf32>
    %88 = vector.extract_strided_slice %4 {offsets = [0, 4], sizes = [6, 1], strides = [1, 1]} : vector<6x6xf32> to vector<6x1xf32>
    %89 = vector.extract_strided_slice %8 {offsets = [4, 0], sizes = [1, 6], strides = [1, 1]} : vector<6x6xf32> to vector<1x6xf32>
    %90 = vector.broadcast %88 : vector<6x1xf32> to vector<6x6xf32>
    %91 = vector.broadcast %89 : vector<1x6xf32> to vector<6x6xf32>
    %92 = arith.mulf %90, %91 : vector<6x6xf32>
    %93 = vector.extract_strided_slice %4 {offsets = [0, 5], sizes = [6, 1], strides = [1, 1]} : vector<6x6xf32> to vector<6x1xf32>
    %94 = vector.extract_strided_slice %8 {offsets = [5, 0], sizes = [1, 6], strides = [1, 1]} : vector<6x6xf32> to vector<1x6xf32>
    %95 = vector.broadcast %93 : vector<6x1xf32> to vector<6x6xf32>
    %96 = vector.broadcast %94 : vector<1x6xf32> to vector<6x6xf32>
    %97 = arith.mulf %95, %96 : vector<6x6xf32>
    %98 = arith.addf %72, %77 : vector<6x6xf32>
    %99 = arith.addf %82, %87 : vector<6x6xf32>
    %100 = arith.addf %98, %99 : vector<6x6xf32>
    %101 = arith.addf %92, %97 : vector<6x6xf32>
    %102 = arith.addf %100, %101 : vector<6x6xf32>
    %103 = vector.extract_strided_slice %14 {offsets = [0, 0], sizes = [6, 1], strides = [1, 1]} : vector<6x6xf32> to vector<6x1xf32>
    %104 = vector.extract_strided_slice %10 {offsets = [0, 0], sizes = [1, 6], strides = [1, 1]} : vector<6x6xf32> to vector<1x6xf32>
    %105 = vector.broadcast %103 : vector<6x1xf32> to vector<6x6xf32>
    %106 = vector.broadcast %104 : vector<1x6xf32> to vector<6x6xf32>
    %107 = arith.mulf %105, %106 : vector<6x6xf32>
    %108 = vector.extract_strided_slice %14 {offsets = [0, 1], sizes = [6, 1], strides = [1, 1]} : vector<6x6xf32> to vector<6x1xf32>
    %109 = vector.extract_strided_slice %10 {offsets = [1, 0], sizes = [1, 6], strides = [1, 1]} : vector<6x6xf32> to vector<1x6xf32>
    %110 = vector.broadcast %108 : vector<6x1xf32> to vector<6x6xf32>
    %111 = vector.broadcast %109 : vector<1x6xf32> to vector<6x6xf32>
    %112 = arith.mulf %110, %111 : vector<6x6xf32>
    %113 = vector.extract_strided_slice %14 {offsets = [0, 2], sizes = [6, 1], strides = [1, 1]} : vector<6x6xf32> to vector<6x1xf32>
    %114 = vector.extract_strided_slice %10 {offsets = [2, 0], sizes = [1, 6], strides = [1, 1]} : vector<6x6xf32> to vector<1x6xf32>
    %115 = vector.broadcast %113 : vector<6x1xf32> to vector<6x6xf32>
    %116 = vector.broadcast %114 : vector<1x6xf32> to vector<6x6xf32>
    %117 = arith.mulf %115, %116 : vector<6x6xf32>
    %118 = vector.extract_strided_slice %14 {offsets = [0, 3], sizes = [6, 1], strides = [1, 1]} : vector<6x6xf32> to vector<6x1xf32>
    %119 = vector.extract_strided_slice %10 {offsets = [3, 0], sizes = [1, 6], strides = [1, 1]} : vector<6x6xf32> to vector<1x6xf32>
    %120 = vector.broadcast %118 : vector<6x1xf32> to vector<6x6xf32>
    %121 = vector.broadcast %119 : vector<1x6xf32> to vector<6x6xf32>
    %122 = arith.mulf %120, %121 : vector<6x6xf32>
    %123 = vector.extract_strided_slice %14 {offsets = [0, 4], sizes = [6, 1], strides = [1, 1]} : vector<6x6xf32> to vector<6x1xf32>
    %124 = vector.extract_strided_slice %10 {offsets = [4, 0], sizes = [1, 6], strides = [1, 1]} : vector<6x6xf32> to vector<1x6xf32>
    %125 = vector.broadcast %123 : vector<6x1xf32> to vector<6x6xf32>
    %126 = vector.broadcast %124 : vector<1x6xf32> to vector<6x6xf32>
    %127 = arith.mulf %125, %126 : vector<6x6xf32>
    %128 = vector.extract_strided_slice %14 {offsets = [0, 5], sizes = [6, 1], strides = [1, 1]} : vector<6x6xf32> to vector<6x1xf32>
    %129 = vector.extract_strided_slice %10 {offsets = [5, 0], sizes = [1, 6], strides = [1, 1]} : vector<6x6xf32> to vector<1x6xf32>
    %130 = vector.broadcast %128 : vector<6x1xf32> to vector<6x6xf32>
    %131 = vector.broadcast %129 : vector<1x6xf32> to vector<6x6xf32>
    %132 = arith.mulf %130, %131 : vector<6x6xf32>
    %133 = arith.addf %107, %112 : vector<6x6xf32>
    %134 = arith.addf %117, %122 : vector<6x6xf32>
    %135 = arith.addf %133, %134 : vector<6x6xf32>
    %136 = arith.addf %127, %132 : vector<6x6xf32>
    %137 = arith.addf %135, %136 : vector<6x6xf32>
    %138 = vector.extract_strided_slice %12 {offsets = [0, 0], sizes = [6, 1], strides = [1, 1]} : vector<6x6xf32> to vector<6x1xf32>
    %139 = vector.extract_strided_slice %16 {offsets = [0, 0], sizes = [1, 6], strides = [1, 1]} : vector<6x6xf32> to vector<1x6xf32>
    %140 = vector.broadcast %138 : vector<6x1xf32> to vector<6x6xf32>
    %141 = vector.broadcast %139 : vector<1x6xf32> to vector<6x6xf32>
    %142 = arith.mulf %140, %141 : vector<6x6xf32>
    %143 = vector.extract_strided_slice %12 {offsets = [0, 1], sizes = [6, 1], strides = [1, 1]} : vector<6x6xf32> to vector<6x1xf32>
    %144 = vector.extract_strided_slice %16 {offsets = [1, 0], sizes = [1, 6], strides = [1, 1]} : vector<6x6xf32> to vector<1x6xf32>
    %145 = vector.broadcast %143 : vector<6x1xf32> to vector<6x6xf32>
    %146 = vector.broadcast %144 : vector<1x6xf32> to vector<6x6xf32>
    %147 = arith.mulf %145, %146 : vector<6x6xf32>
    %148 = vector.extract_strided_slice %12 {offsets = [0, 2], sizes = [6, 1], strides = [1, 1]} : vector<6x6xf32> to vector<6x1xf32>
    %149 = vector.extract_strided_slice %16 {offsets = [2, 0], sizes = [1, 6], strides = [1, 1]} : vector<6x6xf32> to vector<1x6xf32>
    %150 = vector.broadcast %148 : vector<6x1xf32> to vector<6x6xf32>
    %151 = vector.broadcast %149 : vector<1x6xf32> to vector<6x6xf32>
    %152 = arith.mulf %150, %151 : vector<6x6xf32>
    %153 = vector.extract_strided_slice %12 {offsets = [0, 3], sizes = [6, 1], strides = [1, 1]} : vector<6x6xf32> to vector<6x1xf32>
    %154 = vector.extract_strided_slice %16 {offsets = [3, 0], sizes = [1, 6], strides = [1, 1]} : vector<6x6xf32> to vector<1x6xf32>
    %155 = vector.broadcast %153 : vector<6x1xf32> to vector<6x6xf32>
    %156 = vector.broadcast %154 : vector<1x6xf32> to vector<6x6xf32>
    %157 = arith.mulf %155, %156 : vector<6x6xf32>
    %158 = vector.extract_strided_slice %12 {offsets = [0, 4], sizes = [6, 1], strides = [1, 1]} : vector<6x6xf32> to vector<6x1xf32>
    %159 = vector.extract_strided_slice %16 {offsets = [4, 0], sizes = [1, 6], strides = [1, 1]} : vector<6x6xf32> to vector<1x6xf32>
    %160 = vector.broadcast %158 : vector<6x1xf32> to vector<6x6xf32>
    %161 = vector.broadcast %159 : vector<1x6xf32> to vector<6x6xf32>
    %162 = arith.mulf %160, %161 : vector<6x6xf32>
    %163 = vector.extract_strided_slice %12 {offsets = [0, 5], sizes = [6, 1], strides = [1, 1]} : vector<6x6xf32> to vector<6x1xf32>
    %164 = vector.extract_strided_slice %16 {offsets = [5, 0], sizes = [1, 6], strides = [1, 1]} : vector<6x6xf32> to vector<1x6xf32>
    %165 = vector.broadcast %163 : vector<6x1xf32> to vector<6x6xf32>
    %166 = vector.broadcast %164 : vector<1x6xf32> to vector<6x6xf32>
    %167 = arith.mulf %165, %166 : vector<6x6xf32>
    %168 = arith.addf %142, %147 : vector<6x6xf32>
    %169 = arith.addf %152, %157 : vector<6x6xf32>
    %170 = arith.addf %168, %169 : vector<6x6xf32>
    %171 = arith.addf %162, %167 : vector<6x6xf32>
    %172 = arith.addf %170, %171 : vector<6x6xf32>
    %173 = vector.extract_strided_slice %22 {offsets = [0, 0], sizes = [6, 1], strides = [1, 1]} : vector<6x6xf32> to vector<6x1xf32>
    %174 = vector.extract_strided_slice %18 {offsets = [0, 0], sizes = [1, 6], strides = [1, 1]} : vector<6x6xf32> to vector<1x6xf32>
    %175 = vector.broadcast %173 : vector<6x1xf32> to vector<6x6xf32>
    %176 = vector.broadcast %174 : vector<1x6xf32> to vector<6x6xf32>
    %177 = arith.mulf %175, %176 : vector<6x6xf32>
    %178 = vector.extract_strided_slice %22 {offsets = [0, 1], sizes = [6, 1], strides = [1, 1]} : vector<6x6xf32> to vector<6x1xf32>
    %179 = vector.extract_strided_slice %18 {offsets = [1, 0], sizes = [1, 6], strides = [1, 1]} : vector<6x6xf32> to vector<1x6xf32>
    %180 = vector.broadcast %178 : vector<6x1xf32> to vector<6x6xf32>
    %181 = vector.broadcast %179 : vector<1x6xf32> to vector<6x6xf32>
    %182 = arith.mulf %180, %181 : vector<6x6xf32>
    %183 = vector.extract_strided_slice %22 {offsets = [0, 2], sizes = [6, 1], strides = [1, 1]} : vector<6x6xf32> to vector<6x1xf32>
    %184 = vector.extract_strided_slice %18 {offsets = [2, 0], sizes = [1, 6], strides = [1, 1]} : vector<6x6xf32> to vector<1x6xf32>
    %185 = vector.broadcast %183 : vector<6x1xf32> to vector<6x6xf32>
    %186 = vector.broadcast %184 : vector<1x6xf32> to vector<6x6xf32>
    %187 = arith.mulf %185, %186 : vector<6x6xf32>
    %188 = vector.extract_strided_slice %22 {offsets = [0, 3], sizes = [6, 1], strides = [1, 1]} : vector<6x6xf32> to vector<6x1xf32>
    %189 = vector.extract_strided_slice %18 {offsets = [3, 0], sizes = [1, 6], strides = [1, 1]} : vector<6x6xf32> to vector<1x6xf32>
    %190 = vector.broadcast %188 : vector<6x1xf32> to vector<6x6xf32>
    %191 = vector.broadcast %189 : vector<1x6xf32> to vector<6x6xf32>
    %192 = arith.mulf %190, %191 : vector<6x6xf32>
    %193 = vector.extract_strided_slice %22 {offsets = [0, 4], sizes = [6, 1], strides = [1, 1]} : vector<6x6xf32> to vector<6x1xf32>
    %194 = vector.extract_strided_slice %18 {offsets = [4, 0], sizes = [1, 6], strides = [1, 1]} : vector<6x6xf32> to vector<1x6xf32>
    %195 = vector.broadcast %193 : vector<6x1xf32> to vector<6x6xf32>
    %196 = vector.broadcast %194 : vector<1x6xf32> to vector<6x6xf32>
    %197 = arith.mulf %195, %196 : vector<6x6xf32>
    %198 = vector.extract_strided_slice %22 {offsets = [0, 5], sizes = [6, 1], strides = [1, 1]} : vector<6x6xf32> to vector<6x1xf32>
    %199 = vector.extract_strided_slice %18 {offsets = [5, 0], sizes = [1, 6], strides = [1, 1]} : vector<6x6xf32> to vector<1x6xf32>
    %200 = vector.broadcast %198 : vector<6x1xf32> to vector<6x6xf32>
    %201 = vector.broadcast %199 : vector<1x6xf32> to vector<6x6xf32>
    %202 = arith.mulf %200, %201 : vector<6x6xf32>
    %203 = arith.addf %177, %182 : vector<6x6xf32>
    %204 = arith.addf %187, %192 : vector<6x6xf32>
    %205 = arith.addf %203, %204 : vector<6x6xf32>
    %206 = arith.addf %197, %202 : vector<6x6xf32>
    %207 = arith.addf %205, %206 : vector<6x6xf32>
    %208 = vector.extract_strided_slice %20 {offsets = [0, 0], sizes = [6, 1], strides = [1, 1]} : vector<6x6xf32> to vector<6x1xf32>
    %209 = vector.extract_strided_slice %24 {offsets = [0, 0], sizes = [1, 6], strides = [1, 1]} : vector<6x6xf32> to vector<1x6xf32>
    %210 = vector.broadcast %208 : vector<6x1xf32> to vector<6x6xf32>
    %211 = vector.broadcast %209 : vector<1x6xf32> to vector<6x6xf32>
    %212 = arith.mulf %210, %211 : vector<6x6xf32>
    %213 = vector.extract_strided_slice %20 {offsets = [0, 1], sizes = [6, 1], strides = [1, 1]} : vector<6x6xf32> to vector<6x1xf32>
    %214 = vector.extract_strided_slice %24 {offsets = [1, 0], sizes = [1, 6], strides = [1, 1]} : vector<6x6xf32> to vector<1x6xf32>
    %215 = vector.broadcast %213 : vector<6x1xf32> to vector<6x6xf32>
    %216 = vector.broadcast %214 : vector<1x6xf32> to vector<6x6xf32>
    %217 = arith.mulf %215, %216 : vector<6x6xf32>
    %218 = vector.extract_strided_slice %20 {offsets = [0, 2], sizes = [6, 1], strides = [1, 1]} : vector<6x6xf32> to vector<6x1xf32>
    %219 = vector.extract_strided_slice %24 {offsets = [2, 0], sizes = [1, 6], strides = [1, 1]} : vector<6x6xf32> to vector<1x6xf32>
    %220 = vector.broadcast %218 : vector<6x1xf32> to vector<6x6xf32>
    %221 = vector.broadcast %219 : vector<1x6xf32> to vector<6x6xf32>
    %222 = arith.mulf %220, %221 : vector<6x6xf32>
    %223 = vector.extract_strided_slice %20 {offsets = [0, 3], sizes = [6, 1], strides = [1, 1]} : vector<6x6xf32> to vector<6x1xf32>
    %224 = vector.extract_strided_slice %24 {offsets = [3, 0], sizes = [1, 6], strides = [1, 1]} : vector<6x6xf32> to vector<1x6xf32>
    %225 = vector.broadcast %223 : vector<6x1xf32> to vector<6x6xf32>
    %226 = vector.broadcast %224 : vector<1x6xf32> to vector<6x6xf32>
    %227 = arith.mulf %225, %226 : vector<6x6xf32>
    %228 = vector.extract_strided_slice %20 {offsets = [0, 4], sizes = [6, 1], strides = [1, 1]} : vector<6x6xf32> to vector<6x1xf32>
    %229 = vector.extract_strided_slice %24 {offsets = [4, 0], sizes = [1, 6], strides = [1, 1]} : vector<6x6xf32> to vector<1x6xf32>
    %230 = vector.broadcast %228 : vector<6x1xf32> to vector<6x6xf32>
    %231 = vector.broadcast %229 : vector<1x6xf32> to vector<6x6xf32>
    %232 = arith.mulf %230, %231 : vector<6x6xf32>
    %233 = vector.extract_strided_slice %20 {offsets = [0, 5], sizes = [6, 1], strides = [1, 1]} : vector<6x6xf32> to vector<6x1xf32>
    %234 = vector.extract_strided_slice %24 {offsets = [5, 0], sizes = [1, 6], strides = [1, 1]} : vector<6x6xf32> to vector<1x6xf32>
    %235 = vector.broadcast %233 : vector<6x1xf32> to vector<6x6xf32>
    %236 = vector.broadcast %234 : vector<1x6xf32> to vector<6x6xf32>
    %237 = arith.mulf %235, %236 : vector<6x6xf32>
    %238 = arith.addf %212, %217 : vector<6x6xf32>
    %239 = arith.addf %222, %227 : vector<6x6xf32>
    %240 = arith.addf %238, %239 : vector<6x6xf32>
    %241 = arith.addf %232, %237 : vector<6x6xf32>
    %242 = arith.addf %240, %241 : vector<6x6xf32>
    %243 = vector.extract_strided_slice %30 {offsets = [0, 0], sizes = [6, 1], strides = [1, 1]} : vector<6x6xf32> to vector<6x1xf32>
    %244 = vector.extract_strided_slice %26 {offsets = [0, 0], sizes = [1, 6], strides = [1, 1]} : vector<6x6xf32> to vector<1x6xf32>
    %245 = vector.broadcast %243 : vector<6x1xf32> to vector<6x6xf32>
    %246 = vector.broadcast %244 : vector<1x6xf32> to vector<6x6xf32>
    %247 = arith.mulf %245, %246 : vector<6x6xf32>
    %248 = vector.extract_strided_slice %30 {offsets = [0, 1], sizes = [6, 1], strides = [1, 1]} : vector<6x6xf32> to vector<6x1xf32>
    %249 = vector.extract_strided_slice %26 {offsets = [1, 0], sizes = [1, 6], strides = [1, 1]} : vector<6x6xf32> to vector<1x6xf32>
    %250 = vector.broadcast %248 : vector<6x1xf32> to vector<6x6xf32>
    %251 = vector.broadcast %249 : vector<1x6xf32> to vector<6x6xf32>
    %252 = arith.mulf %250, %251 : vector<6x6xf32>
    %253 = vector.extract_strided_slice %30 {offsets = [0, 2], sizes = [6, 1], strides = [1, 1]} : vector<6x6xf32> to vector<6x1xf32>
    %254 = vector.extract_strided_slice %26 {offsets = [2, 0], sizes = [1, 6], strides = [1, 1]} : vector<6x6xf32> to vector<1x6xf32>
    %255 = vector.broadcast %253 : vector<6x1xf32> to vector<6x6xf32>
    %256 = vector.broadcast %254 : vector<1x6xf32> to vector<6x6xf32>
    %257 = arith.mulf %255, %256 : vector<6x6xf32>
    %258 = vector.extract_strided_slice %30 {offsets = [0, 3], sizes = [6, 1], strides = [1, 1]} : vector<6x6xf32> to vector<6x1xf32>
    %259 = vector.extract_strided_slice %26 {offsets = [3, 0], sizes = [1, 6], strides = [1, 1]} : vector<6x6xf32> to vector<1x6xf32>
    %260 = vector.broadcast %258 : vector<6x1xf32> to vector<6x6xf32>
    %261 = vector.broadcast %259 : vector<1x6xf32> to vector<6x6xf32>
    %262 = arith.mulf %260, %261 : vector<6x6xf32>
    %263 = vector.extract_strided_slice %30 {offsets = [0, 4], sizes = [6, 1], strides = [1, 1]} : vector<6x6xf32> to vector<6x1xf32>
    %264 = vector.extract_strided_slice %26 {offsets = [4, 0], sizes = [1, 6], strides = [1, 1]} : vector<6x6xf32> to vector<1x6xf32>
    %265 = vector.broadcast %263 : vector<6x1xf32> to vector<6x6xf32>
    %266 = vector.broadcast %264 : vector<1x6xf32> to vector<6x6xf32>
    %267 = arith.mulf %265, %266 : vector<6x6xf32>
    %268 = vector.extract_strided_slice %30 {offsets = [0, 5], sizes = [6, 1], strides = [1, 1]} : vector<6x6xf32> to vector<6x1xf32>
    %269 = vector.extract_strided_slice %26 {offsets = [5, 0], sizes = [1, 6], strides = [1, 1]} : vector<6x6xf32> to vector<1x6xf32>
    %270 = vector.broadcast %268 : vector<6x1xf32> to vector<6x6xf32>
    %271 = vector.broadcast %269 : vector<1x6xf32> to vector<6x6xf32>
    %272 = arith.mulf %270, %271 : vector<6x6xf32>
    %273 = arith.addf %247, %252 : vector<6x6xf32>
    %274 = arith.addf %257, %262 : vector<6x6xf32>
    %275 = arith.addf %273, %274 : vector<6x6xf32>
    %276 = arith.addf %267, %272 : vector<6x6xf32>
    %277 = arith.addf %275, %276 : vector<6x6xf32>
    %278 = vector.extract_strided_slice %28 {offsets = [0, 0], sizes = [6, 1], strides = [1, 1]} : vector<6x6xf32> to vector<6x1xf32>
    %279 = vector.extract_strided_slice %32 {offsets = [0, 0], sizes = [1, 6], strides = [1, 1]} : vector<6x6xf32> to vector<1x6xf32>
    %280 = vector.broadcast %278 : vector<6x1xf32> to vector<6x6xf32>
    %281 = vector.broadcast %279 : vector<1x6xf32> to vector<6x6xf32>
    %282 = arith.mulf %280, %281 : vector<6x6xf32>
    %283 = vector.extract_strided_slice %28 {offsets = [0, 1], sizes = [6, 1], strides = [1, 1]} : vector<6x6xf32> to vector<6x1xf32>
    %284 = vector.extract_strided_slice %32 {offsets = [1, 0], sizes = [1, 6], strides = [1, 1]} : vector<6x6xf32> to vector<1x6xf32>
    %285 = vector.broadcast %283 : vector<6x1xf32> to vector<6x6xf32>
    %286 = vector.broadcast %284 : vector<1x6xf32> to vector<6x6xf32>
    %287 = arith.mulf %285, %286 : vector<6x6xf32>
    %288 = vector.extract_strided_slice %28 {offsets = [0, 2], sizes = [6, 1], strides = [1, 1]} : vector<6x6xf32> to vector<6x1xf32>
    %289 = vector.extract_strided_slice %32 {offsets = [2, 0], sizes = [1, 6], strides = [1, 1]} : vector<6x6xf32> to vector<1x6xf32>
    %290 = vector.broadcast %288 : vector<6x1xf32> to vector<6x6xf32>
    %291 = vector.broadcast %289 : vector<1x6xf32> to vector<6x6xf32>
    %292 = arith.mulf %290, %291 : vector<6x6xf32>
    %293 = vector.extract_strided_slice %28 {offsets = [0, 3], sizes = [6, 1], strides = [1, 1]} : vector<6x6xf32> to vector<6x1xf32>
    %294 = vector.extract_strided_slice %32 {offsets = [3, 0], sizes = [1, 6], strides = [1, 1]} : vector<6x6xf32> to vector<1x6xf32>
    %295 = vector.broadcast %293 : vector<6x1xf32> to vector<6x6xf32>
    %296 = vector.broadcast %294 : vector<1x6xf32> to vector<6x6xf32>
    %297 = arith.mulf %295, %296 : vector<6x6xf32>
    %298 = vector.extract_strided_slice %28 {offsets = [0, 4], sizes = [6, 1], strides = [1, 1]} : vector<6x6xf32> to vector<6x1xf32>
    %299 = vector.extract_strided_slice %32 {offsets = [4, 0], sizes = [1, 6], strides = [1, 1]} : vector<6x6xf32> to vector<1x6xf32>
    %300 = vector.broadcast %298 : vector<6x1xf32> to vector<6x6xf32>
    %301 = vector.broadcast %299 : vector<1x6xf32> to vector<6x6xf32>
    %302 = arith.mulf %300, %301 : vector<6x6xf32>
    %303 = vector.extract_strided_slice %28 {offsets = [0, 5], sizes = [6, 1], strides = [1, 1]} : vector<6x6xf32> to vector<6x1xf32>
    %304 = vector.extract_strided_slice %32 {offsets = [5, 0], sizes = [1, 6], strides = [1, 1]} : vector<6x6xf32> to vector<1x6xf32>
    %305 = vector.broadcast %303 : vector<6x1xf32> to vector<6x6xf32>
    %306 = vector.broadcast %304 : vector<1x6xf32> to vector<6x6xf32>
    %307 = arith.mulf %305, %306 : vector<6x6xf32>
    %308 = arith.addf %282, %287 : vector<6x6xf32>
    %309 = arith.addf %292, %297 : vector<6x6xf32>
    %310 = arith.addf %308, %309 : vector<6x6xf32>
    %311 = arith.addf %302, %307 : vector<6x6xf32>
    %312 = arith.addf %310, %311 : vector<6x6xf32>
    %313 = vector.extract_strided_slice %137 {offsets = [0, 0], sizes = [6, 1], strides = [1, 1]} : vector<6x6xf32> to vector<6x1xf32>
    %314 = vector.extract_strided_slice %67 {offsets = [0, 0], sizes = [1, 6], strides = [1, 1]} : vector<6x6xf32> to vector<1x6xf32>
    %315 = vector.broadcast %313 : vector<6x1xf32> to vector<6x6xf32>
    %316 = vector.broadcast %314 : vector<1x6xf32> to vector<6x6xf32>
    %317 = arith.mulf %315, %316 : vector<6x6xf32>
    %318 = vector.extract_strided_slice %137 {offsets = [0, 1], sizes = [6, 1], strides = [1, 1]} : vector<6x6xf32> to vector<6x1xf32>
    %319 = vector.extract_strided_slice %67 {offsets = [1, 0], sizes = [1, 6], strides = [1, 1]} : vector<6x6xf32> to vector<1x6xf32>
    %320 = vector.broadcast %318 : vector<6x1xf32> to vector<6x6xf32>
    %321 = vector.broadcast %319 : vector<1x6xf32> to vector<6x6xf32>
    %322 = arith.mulf %320, %321 : vector<6x6xf32>
    %323 = vector.extract_strided_slice %137 {offsets = [0, 2], sizes = [6, 1], strides = [1, 1]} : vector<6x6xf32> to vector<6x1xf32>
    %324 = vector.extract_strided_slice %67 {offsets = [2, 0], sizes = [1, 6], strides = [1, 1]} : vector<6x6xf32> to vector<1x6xf32>
    %325 = vector.broadcast %323 : vector<6x1xf32> to vector<6x6xf32>
    %326 = vector.broadcast %324 : vector<1x6xf32> to vector<6x6xf32>
    %327 = arith.mulf %325, %326 : vector<6x6xf32>
    %328 = vector.extract_strided_slice %137 {offsets = [0, 3], sizes = [6, 1], strides = [1, 1]} : vector<6x6xf32> to vector<6x1xf32>
    %329 = vector.extract_strided_slice %67 {offsets = [3, 0], sizes = [1, 6], strides = [1, 1]} : vector<6x6xf32> to vector<1x6xf32>
    %330 = vector.broadcast %328 : vector<6x1xf32> to vector<6x6xf32>
    %331 = vector.broadcast %329 : vector<1x6xf32> to vector<6x6xf32>
    %332 = arith.mulf %330, %331 : vector<6x6xf32>
    %333 = vector.extract_strided_slice %137 {offsets = [0, 4], sizes = [6, 1], strides = [1, 1]} : vector<6x6xf32> to vector<6x1xf32>
    %334 = vector.extract_strided_slice %67 {offsets = [4, 0], sizes = [1, 6], strides = [1, 1]} : vector<6x6xf32> to vector<1x6xf32>
    %335 = vector.broadcast %333 : vector<6x1xf32> to vector<6x6xf32>
    %336 = vector.broadcast %334 : vector<1x6xf32> to vector<6x6xf32>
    %337 = arith.mulf %335, %336 : vector<6x6xf32>
    %338 = vector.extract_strided_slice %137 {offsets = [0, 5], sizes = [6, 1], strides = [1, 1]} : vector<6x6xf32> to vector<6x1xf32>
    %339 = vector.extract_strided_slice %67 {offsets = [5, 0], sizes = [1, 6], strides = [1, 1]} : vector<6x6xf32> to vector<1x6xf32>
    %340 = vector.broadcast %338 : vector<6x1xf32> to vector<6x6xf32>
    %341 = vector.broadcast %339 : vector<1x6xf32> to vector<6x6xf32>
    %342 = arith.mulf %340, %341 : vector<6x6xf32>
    %343 = arith.addf %317, %322 : vector<6x6xf32>
    %344 = arith.addf %327, %332 : vector<6x6xf32>
    %345 = arith.addf %343, %344 : vector<6x6xf32>
    %346 = arith.addf %337, %342 : vector<6x6xf32>
    %347 = arith.addf %345, %346 : vector<6x6xf32>
    %348 = vector.extract_strided_slice %102 {offsets = [0, 0], sizes = [6, 1], strides = [1, 1]} : vector<6x6xf32> to vector<6x1xf32>
    %349 = vector.extract_strided_slice %172 {offsets = [0, 0], sizes = [1, 6], strides = [1, 1]} : vector<6x6xf32> to vector<1x6xf32>
    %350 = vector.broadcast %348 : vector<6x1xf32> to vector<6x6xf32>
    %351 = vector.broadcast %349 : vector<1x6xf32> to vector<6x6xf32>
    %352 = arith.mulf %350, %351 : vector<6x6xf32>
    %353 = vector.extract_strided_slice %102 {offsets = [0, 1], sizes = [6, 1], strides = [1, 1]} : vector<6x6xf32> to vector<6x1xf32>
    %354 = vector.extract_strided_slice %172 {offsets = [1, 0], sizes = [1, 6], strides = [1, 1]} : vector<6x6xf32> to vector<1x6xf32>
    %355 = vector.broadcast %353 : vector<6x1xf32> to vector<6x6xf32>
    %356 = vector.broadcast %354 : vector<1x6xf32> to vector<6x6xf32>
    %357 = arith.mulf %355, %356 : vector<6x6xf32>
    %358 = vector.extract_strided_slice %102 {offsets = [0, 2], sizes = [6, 1], strides = [1, 1]} : vector<6x6xf32> to vector<6x1xf32>
    %359 = vector.extract_strided_slice %172 {offsets = [2, 0], sizes = [1, 6], strides = [1, 1]} : vector<6x6xf32> to vector<1x6xf32>
    %360 = vector.broadcast %358 : vector<6x1xf32> to vector<6x6xf32>
    %361 = vector.broadcast %359 : vector<1x6xf32> to vector<6x6xf32>
    %362 = arith.mulf %360, %361 : vector<6x6xf32>
    %363 = vector.extract_strided_slice %102 {offsets = [0, 3], sizes = [6, 1], strides = [1, 1]} : vector<6x6xf32> to vector<6x1xf32>
    %364 = vector.extract_strided_slice %172 {offsets = [3, 0], sizes = [1, 6], strides = [1, 1]} : vector<6x6xf32> to vector<1x6xf32>
    %365 = vector.broadcast %363 : vector<6x1xf32> to vector<6x6xf32>
    %366 = vector.broadcast %364 : vector<1x6xf32> to vector<6x6xf32>
    %367 = arith.mulf %365, %366 : vector<6x6xf32>
    %368 = vector.extract_strided_slice %102 {offsets = [0, 4], sizes = [6, 1], strides = [1, 1]} : vector<6x6xf32> to vector<6x1xf32>
    %369 = vector.extract_strided_slice %172 {offsets = [4, 0], sizes = [1, 6], strides = [1, 1]} : vector<6x6xf32> to vector<1x6xf32>
    %370 = vector.broadcast %368 : vector<6x1xf32> to vector<6x6xf32>
    %371 = vector.broadcast %369 : vector<1x6xf32> to vector<6x6xf32>
    %372 = arith.mulf %370, %371 : vector<6x6xf32>
    %373 = vector.extract_strided_slice %102 {offsets = [0, 5], sizes = [6, 1], strides = [1, 1]} : vector<6x6xf32> to vector<6x1xf32>
    %374 = vector.extract_strided_slice %172 {offsets = [5, 0], sizes = [1, 6], strides = [1, 1]} : vector<6x6xf32> to vector<1x6xf32>
    %375 = vector.broadcast %373 : vector<6x1xf32> to vector<6x6xf32>
    %376 = vector.broadcast %374 : vector<1x6xf32> to vector<6x6xf32>
    %377 = arith.mulf %375, %376 : vector<6x6xf32>
    %378 = arith.addf %352, %357 : vector<6x6xf32>
    %379 = arith.addf %362, %367 : vector<6x6xf32>
    %380 = arith.addf %378, %379 : vector<6x6xf32>
    %381 = arith.addf %372, %377 : vector<6x6xf32>
    %382 = arith.addf %380, %381 : vector<6x6xf32>
    %383 = vector.extract_strided_slice %277 {offsets = [0, 0], sizes = [6, 1], strides = [1, 1]} : vector<6x6xf32> to vector<6x1xf32>
    %384 = vector.extract_strided_slice %207 {offsets = [0, 0], sizes = [1, 6], strides = [1, 1]} : vector<6x6xf32> to vector<1x6xf32>
    %385 = vector.broadcast %383 : vector<6x1xf32> to vector<6x6xf32>
    %386 = vector.broadcast %384 : vector<1x6xf32> to vector<6x6xf32>
    %387 = arith.mulf %385, %386 : vector<6x6xf32>
    %388 = vector.extract_strided_slice %277 {offsets = [0, 1], sizes = [6, 1], strides = [1, 1]} : vector<6x6xf32> to vector<6x1xf32>
    %389 = vector.extract_strided_slice %207 {offsets = [1, 0], sizes = [1, 6], strides = [1, 1]} : vector<6x6xf32> to vector<1x6xf32>
    %390 = vector.broadcast %388 : vector<6x1xf32> to vector<6x6xf32>
    %391 = vector.broadcast %389 : vector<1x6xf32> to vector<6x6xf32>
    %392 = arith.mulf %390, %391 : vector<6x6xf32>
    %393 = vector.extract_strided_slice %277 {offsets = [0, 2], sizes = [6, 1], strides = [1, 1]} : vector<6x6xf32> to vector<6x1xf32>
    %394 = vector.extract_strided_slice %207 {offsets = [2, 0], sizes = [1, 6], strides = [1, 1]} : vector<6x6xf32> to vector<1x6xf32>
    %395 = vector.broadcast %393 : vector<6x1xf32> to vector<6x6xf32>
    %396 = vector.broadcast %394 : vector<1x6xf32> to vector<6x6xf32>
    %397 = arith.mulf %395, %396 : vector<6x6xf32>
    %398 = vector.extract_strided_slice %277 {offsets = [0, 3], sizes = [6, 1], strides = [1, 1]} : vector<6x6xf32> to vector<6x1xf32>
    %399 = vector.extract_strided_slice %207 {offsets = [3, 0], sizes = [1, 6], strides = [1, 1]} : vector<6x6xf32> to vector<1x6xf32>
    %400 = vector.broadcast %398 : vector<6x1xf32> to vector<6x6xf32>
    %401 = vector.broadcast %399 : vector<1x6xf32> to vector<6x6xf32>
    %402 = arith.mulf %400, %401 : vector<6x6xf32>
    %403 = vector.extract_strided_slice %277 {offsets = [0, 4], sizes = [6, 1], strides = [1, 1]} : vector<6x6xf32> to vector<6x1xf32>
    %404 = vector.extract_strided_slice %207 {offsets = [4, 0], sizes = [1, 6], strides = [1, 1]} : vector<6x6xf32> to vector<1x6xf32>
    %405 = vector.broadcast %403 : vector<6x1xf32> to vector<6x6xf32>
    %406 = vector.broadcast %404 : vector<1x6xf32> to vector<6x6xf32>
    %407 = arith.mulf %405, %406 : vector<6x6xf32>
    %408 = vector.extract_strided_slice %277 {offsets = [0, 5], sizes = [6, 1], strides = [1, 1]} : vector<6x6xf32> to vector<6x1xf32>
    %409 = vector.extract_strided_slice %207 {offsets = [5, 0], sizes = [1, 6], strides = [1, 1]} : vector<6x6xf32> to vector<1x6xf32>
    %410 = vector.broadcast %408 : vector<6x1xf32> to vector<6x6xf32>
    %411 = vector.broadcast %409 : vector<1x6xf32> to vector<6x6xf32>
    %412 = arith.mulf %410, %411 : vector<6x6xf32>
    %413 = arith.addf %387, %392 : vector<6x6xf32>
    %414 = arith.addf %397, %402 : vector<6x6xf32>
    %415 = arith.addf %413, %414 : vector<6x6xf32>
    %416 = arith.addf %407, %412 : vector<6x6xf32>
    %417 = arith.addf %415, %416 : vector<6x6xf32>
    %418 = vector.extract_strided_slice %242 {offsets = [0, 0], sizes = [6, 1], strides = [1, 1]} : vector<6x6xf32> to vector<6x1xf32>
    %419 = vector.extract_strided_slice %312 {offsets = [0, 0], sizes = [1, 6], strides = [1, 1]} : vector<6x6xf32> to vector<1x6xf32>
    %420 = vector.broadcast %418 : vector<6x1xf32> to vector<6x6xf32>
    %421 = vector.broadcast %419 : vector<1x6xf32> to vector<6x6xf32>
    %422 = arith.mulf %420, %421 : vector<6x6xf32>
    %423 = vector.extract_strided_slice %242 {offsets = [0, 1], sizes = [6, 1], strides = [1, 1]} : vector<6x6xf32> to vector<6x1xf32>
    %424 = vector.extract_strided_slice %312 {offsets = [1, 0], sizes = [1, 6], strides = [1, 1]} : vector<6x6xf32> to vector<1x6xf32>
    %425 = vector.broadcast %423 : vector<6x1xf32> to vector<6x6xf32>
    %426 = vector.broadcast %424 : vector<1x6xf32> to vector<6x6xf32>
    %427 = arith.mulf %425, %426 : vector<6x6xf32>
    %428 = vector.extract_strided_slice %242 {offsets = [0, 2], sizes = [6, 1], strides = [1, 1]} : vector<6x6xf32> to vector<6x1xf32>
    %429 = vector.extract_strided_slice %312 {offsets = [2, 0], sizes = [1, 6], strides = [1, 1]} : vector<6x6xf32> to vector<1x6xf32>
    %430 = vector.broadcast %428 : vector<6x1xf32> to vector<6x6xf32>
    %431 = vector.broadcast %429 : vector<1x6xf32> to vector<6x6xf32>
    %432 = arith.mulf %430, %431 : vector<6x6xf32>
    %433 = vector.extract_strided_slice %242 {offsets = [0, 3], sizes = [6, 1], strides = [1, 1]} : vector<6x6xf32> to vector<6x1xf32>
    %434 = vector.extract_strided_slice %312 {offsets = [3, 0], sizes = [1, 6], strides = [1, 1]} : vector<6x6xf32> to vector<1x6xf32>
    %435 = vector.broadcast %433 : vector<6x1xf32> to vector<6x6xf32>
    %436 = vector.broadcast %434 : vector<1x6xf32> to vector<6x6xf32>
    %437 = arith.mulf %435, %436 : vector<6x6xf32>
    %438 = vector.extract_strided_slice %242 {offsets = [0, 4], sizes = [6, 1], strides = [1, 1]} : vector<6x6xf32> to vector<6x1xf32>
    %439 = vector.extract_strided_slice %312 {offsets = [4, 0], sizes = [1, 6], strides = [1, 1]} : vector<6x6xf32> to vector<1x6xf32>
    %440 = vector.broadcast %438 : vector<6x1xf32> to vector<6x6xf32>
    %441 = vector.broadcast %439 : vector<1x6xf32> to vector<6x6xf32>
    %442 = arith.mulf %440, %441 : vector<6x6xf32>
    %443 = vector.extract_strided_slice %242 {offsets = [0, 5], sizes = [6, 1], strides = [1, 1]} : vector<6x6xf32> to vector<6x1xf32>
    %444 = vector.extract_strided_slice %312 {offsets = [5, 0], sizes = [1, 6], strides = [1, 1]} : vector<6x6xf32> to vector<1x6xf32>
    %445 = vector.broadcast %443 : vector<6x1xf32> to vector<6x6xf32>
    %446 = vector.broadcast %444 : vector<1x6xf32> to vector<6x6xf32>
    %447 = arith.mulf %445, %446 : vector<6x6xf32>
    %448 = arith.addf %422, %427 : vector<6x6xf32>
    %449 = arith.addf %432, %437 : vector<6x6xf32>
    %450 = arith.addf %448, %449 : vector<6x6xf32>
    %451 = arith.addf %442, %447 : vector<6x6xf32>
    %452 = arith.addf %450, %451 : vector<6x6xf32>
    %453 = vector.extract_strided_slice %417 {offsets = [0, 0], sizes = [6, 1], strides = [1, 1]} : vector<6x6xf32> to vector<6x1xf32>
    %454 = vector.extract_strided_slice %347 {offsets = [0, 0], sizes = [1, 6], strides = [1, 1]} : vector<6x6xf32> to vector<1x6xf32>
    %455 = vector.broadcast %453 : vector<6x1xf32> to vector<6x6xf32>
    %456 = vector.broadcast %454 : vector<1x6xf32> to vector<6x6xf32>
    %457 = arith.mulf %455, %456 : vector<6x6xf32>
    %458 = vector.extract_strided_slice %417 {offsets = [0, 1], sizes = [6, 1], strides = [1, 1]} : vector<6x6xf32> to vector<6x1xf32>
    %459 = vector.extract_strided_slice %347 {offsets = [1, 0], sizes = [1, 6], strides = [1, 1]} : vector<6x6xf32> to vector<1x6xf32>
    %460 = vector.broadcast %458 : vector<6x1xf32> to vector<6x6xf32>
    %461 = vector.broadcast %459 : vector<1x6xf32> to vector<6x6xf32>
    %462 = arith.mulf %460, %461 : vector<6x6xf32>
    %463 = vector.extract_strided_slice %417 {offsets = [0, 2], sizes = [6, 1], strides = [1, 1]} : vector<6x6xf32> to vector<6x1xf32>
    %464 = vector.extract_strided_slice %347 {offsets = [2, 0], sizes = [1, 6], strides = [1, 1]} : vector<6x6xf32> to vector<1x6xf32>
    %465 = vector.broadcast %463 : vector<6x1xf32> to vector<6x6xf32>
    %466 = vector.broadcast %464 : vector<1x6xf32> to vector<6x6xf32>
    %467 = arith.mulf %465, %466 : vector<6x6xf32>
    %468 = vector.extract_strided_slice %417 {offsets = [0, 3], sizes = [6, 1], strides = [1, 1]} : vector<6x6xf32> to vector<6x1xf32>
    %469 = vector.extract_strided_slice %347 {offsets = [3, 0], sizes = [1, 6], strides = [1, 1]} : vector<6x6xf32> to vector<1x6xf32>
    %470 = vector.broadcast %468 : vector<6x1xf32> to vector<6x6xf32>
    %471 = vector.broadcast %469 : vector<1x6xf32> to vector<6x6xf32>
    %472 = arith.mulf %470, %471 : vector<6x6xf32>
    %473 = vector.extract_strided_slice %417 {offsets = [0, 4], sizes = [6, 1], strides = [1, 1]} : vector<6x6xf32> to vector<6x1xf32>
    %474 = vector.extract_strided_slice %347 {offsets = [4, 0], sizes = [1, 6], strides = [1, 1]} : vector<6x6xf32> to vector<1x6xf32>
    %475 = vector.broadcast %473 : vector<6x1xf32> to vector<6x6xf32>
    %476 = vector.broadcast %474 : vector<1x6xf32> to vector<6x6xf32>
    %477 = arith.mulf %475, %476 : vector<6x6xf32>
    %478 = vector.extract_strided_slice %417 {offsets = [0, 5], sizes = [6, 1], strides = [1, 1]} : vector<6x6xf32> to vector<6x1xf32>
    %479 = vector.extract_strided_slice %347 {offsets = [5, 0], sizes = [1, 6], strides = [1, 1]} : vector<6x6xf32> to vector<1x6xf32>
    %480 = vector.broadcast %478 : vector<6x1xf32> to vector<6x6xf32>
    %481 = vector.broadcast %479 : vector<1x6xf32> to vector<6x6xf32>
    %482 = arith.mulf %480, %481 : vector<6x6xf32>
    %483 = arith.addf %457, %462 : vector<6x6xf32>
    %484 = arith.addf %467, %472 : vector<6x6xf32>
    %485 = arith.addf %483, %484 : vector<6x6xf32>
    %486 = arith.addf %477, %482 : vector<6x6xf32>
    %487 = arith.addf %485, %486 : vector<6x6xf32>
    %488 = vector.extract_strided_slice %382 {offsets = [0, 0], sizes = [6, 1], strides = [1, 1]} : vector<6x6xf32> to vector<6x1xf32>
    %489 = vector.extract_strided_slice %452 {offsets = [0, 0], sizes = [1, 6], strides = [1, 1]} : vector<6x6xf32> to vector<1x6xf32>
    %490 = vector.broadcast %488 : vector<6x1xf32> to vector<6x6xf32>
    %491 = vector.broadcast %489 : vector<1x6xf32> to vector<6x6xf32>
    %492 = arith.mulf %490, %491 : vector<6x6xf32>
    %493 = vector.extract_strided_slice %382 {offsets = [0, 1], sizes = [6, 1], strides = [1, 1]} : vector<6x6xf32> to vector<6x1xf32>
    %494 = vector.extract_strided_slice %452 {offsets = [1, 0], sizes = [1, 6], strides = [1, 1]} : vector<6x6xf32> to vector<1x6xf32>
    %495 = vector.broadcast %493 : vector<6x1xf32> to vector<6x6xf32>
    %496 = vector.broadcast %494 : vector<1x6xf32> to vector<6x6xf32>
    %497 = arith.mulf %495, %496 : vector<6x6xf32>
    %498 = vector.extract_strided_slice %382 {offsets = [0, 2], sizes = [6, 1], strides = [1, 1]} : vector<6x6xf32> to vector<6x1xf32>
    %499 = vector.extract_strided_slice %452 {offsets = [2, 0], sizes = [1, 6], strides = [1, 1]} : vector<6x6xf32> to vector<1x6xf32>
    %500 = vector.broadcast %498 : vector<6x1xf32> to vector<6x6xf32>
    %501 = vector.broadcast %499 : vector<1x6xf32> to vector<6x6xf32>
    %502 = arith.mulf %500, %501 : vector<6x6xf32>
    %503 = vector.extract_strided_slice %382 {offsets = [0, 3], sizes = [6, 1], strides = [1, 1]} : vector<6x6xf32> to vector<6x1xf32>
    %504 = vector.extract_strided_slice %452 {offsets = [3, 0], sizes = [1, 6], strides = [1, 1]} : vector<6x6xf32> to vector<1x6xf32>
    %505 = vector.broadcast %503 : vector<6x1xf32> to vector<6x6xf32>
    %506 = vector.broadcast %504 : vector<1x6xf32> to vector<6x6xf32>
    %507 = arith.mulf %505, %506 : vector<6x6xf32>
    %508 = vector.extract_strided_slice %382 {offsets = [0, 4], sizes = [6, 1], strides = [1, 1]} : vector<6x6xf32> to vector<6x1xf32>
    %509 = vector.extract_strided_slice %452 {offsets = [4, 0], sizes = [1, 6], strides = [1, 1]} : vector<6x6xf32> to vector<1x6xf32>
    %510 = vector.broadcast %508 : vector<6x1xf32> to vector<6x6xf32>
    %511 = vector.broadcast %509 : vector<1x6xf32> to vector<6x6xf32>
    %512 = arith.mulf %510, %511 : vector<6x6xf32>
    %513 = vector.extract_strided_slice %382 {offsets = [0, 5], sizes = [6, 1], strides = [1, 1]} : vector<6x6xf32> to vector<6x1xf32>
    %514 = vector.extract_strided_slice %452 {offsets = [5, 0], sizes = [1, 6], strides = [1, 1]} : vector<6x6xf32> to vector<1x6xf32>
    %515 = vector.broadcast %513 : vector<6x1xf32> to vector<6x6xf32>
    %516 = vector.broadcast %514 : vector<1x6xf32> to vector<6x6xf32>
    %517 = arith.mulf %515, %516 : vector<6x6xf32>
    %518 = arith.addf %492, %497 : vector<6x6xf32>
    %519 = arith.addf %502, %507 : vector<6x6xf32>
    %520 = arith.addf %518, %519 : vector<6x6xf32>
    %521 = arith.addf %512, %517 : vector<6x6xf32>
    %522 = arith.addf %520, %521 : vector<6x6xf32>
    %523 = vector.extract_strided_slice %0 {offsets = [0, 0], sizes = [1, 6], strides = [1, 1]} : vector<6x6xf32> to vector<1x6xf32>
    %524 = vector.shape_cast %523 : vector<1x6xf32> to vector<1x6xf32>
    %525 = vector.broadcast %524 : vector<1x6xf32> to vector<6x6xf32>
    %526 = vector.extract_strided_slice %0 {offsets = [1, 0], sizes = [1, 6], strides = [1, 1]} : vector<6x6xf32> to vector<1x6xf32>
    %527 = vector.shape_cast %526 : vector<1x6xf32> to vector<1x6xf32>
    %528 = vector.broadcast %527 : vector<1x6xf32> to vector<6x6xf32>
    %529 = vector.extract_strided_slice %0 {offsets = [2, 0], sizes = [1, 6], strides = [1, 1]} : vector<6x6xf32> to vector<1x6xf32>
    %530 = vector.shape_cast %529 : vector<1x6xf32> to vector<1x6xf32>
    %531 = vector.broadcast %530 : vector<1x6xf32> to vector<6x6xf32>
    %532 = vector.extract_strided_slice %0 {offsets = [3, 0], sizes = [1, 6], strides = [1, 1]} : vector<6x6xf32> to vector<1x6xf32>
    %533 = vector.shape_cast %532 : vector<1x6xf32> to vector<1x6xf32>
    %534 = vector.broadcast %533 : vector<1x6xf32> to vector<6x6xf32>
    %535 = vector.extract_strided_slice %0 {offsets = [4, 0], sizes = [1, 6], strides = [1, 1]} : vector<6x6xf32> to vector<1x6xf32>
    %536 = vector.shape_cast %535 : vector<1x6xf32> to vector<1x6xf32>
    %537 = vector.broadcast %536 : vector<1x6xf32> to vector<6x6xf32>
    %538 = vector.extract_strided_slice %0 {offsets = [5, 0], sizes = [1, 6], strides = [1, 1]} : vector<6x6xf32> to vector<1x6xf32>
    %539 = vector.shape_cast %538 : vector<1x6xf32> to vector<1x6xf32>
    %540 = vector.broadcast %539 : vector<1x6xf32> to vector<6x6xf32>
    %541 = vector.extract_strided_slice %487 {offsets = [0, 0], sizes = [6, 1], strides = [1, 1]} : vector<6x6xf32> to vector<6x1xf32>
    %542 = vector.broadcast %541 : vector<6x1xf32> to vector<6x6xf32>
    %543 = arith.mulf %542, %525 : vector<6x6xf32>
    %544 = vector.extract_strided_slice %487 {offsets = [0, 1], sizes = [6, 1], strides = [1, 1]} : vector<6x6xf32> to vector<6x1xf32>
    %545 = vector.broadcast %544 : vector<6x1xf32> to vector<6x6xf32>
    %546 = arith.mulf %545, %528 : vector<6x6xf32>
    %547 = vector.extract_strided_slice %487 {offsets = [0, 2], sizes = [6, 1], strides = [1, 1]} : vector<6x6xf32> to vector<6x1xf32>
    %548 = vector.broadcast %547 : vector<6x1xf32> to vector<6x6xf32>
    %549 = arith.mulf %548, %531 : vector<6x6xf32>
    %550 = vector.extract_strided_slice %487 {offsets = [0, 3], sizes = [6, 1], strides = [1, 1]} : vector<6x6xf32> to vector<6x1xf32>
    %551 = vector.broadcast %550 : vector<6x1xf32> to vector<6x6xf32>
    %552 = arith.mulf %551, %534 : vector<6x6xf32>
    %553 = vector.extract_strided_slice %487 {offsets = [0, 4], sizes = [6, 1], strides = [1, 1]} : vector<6x6xf32> to vector<6x1xf32>
    %554 = vector.broadcast %553 : vector<6x1xf32> to vector<6x6xf32>
    %555 = arith.mulf %554, %537 : vector<6x6xf32>
    %556 = vector.extract_strided_slice %487 {offsets = [0, 5], sizes = [6, 1], strides = [1, 1]} : vector<6x6xf32> to vector<6x1xf32>
    %557 = vector.broadcast %556 : vector<6x1xf32> to vector<6x6xf32>
    %558 = arith.mulf %557, %540 : vector<6x6xf32>
    %559 = arith.addf %543, %546 : vector<6x6xf32>
    %560 = arith.addf %549, %552 : vector<6x6xf32>
    %561 = arith.addf %559, %560 : vector<6x6xf32>
    %562 = arith.addf %555, %558 : vector<6x6xf32>
    %563 = arith.addf %561, %562 : vector<6x6xf32>
    %564 = vector.extract_strided_slice %563 {offsets = [0, 0], sizes = [6, 1], strides = [1, 1]} : vector<6x6xf32> to vector<6x1xf32>
    %565 = vector.extract_strided_slice %522 {offsets = [0, 0], sizes = [1, 6], strides = [1, 1]} : vector<6x6xf32> to vector<1x6xf32>
    %566 = vector.broadcast %564 : vector<6x1xf32> to vector<6x6xf32>
    %567 = vector.broadcast %565 : vector<1x6xf32> to vector<6x6xf32>
    %568 = arith.mulf %566, %567 : vector<6x6xf32>
    %569 = vector.extract_strided_slice %563 {offsets = [0, 1], sizes = [6, 1], strides = [1, 1]} : vector<6x6xf32> to vector<6x1xf32>
    %570 = vector.extract_strided_slice %522 {offsets = [1, 0], sizes = [1, 6], strides = [1, 1]} : vector<6x6xf32> to vector<1x6xf32>
    %571 = vector.broadcast %569 : vector<6x1xf32> to vector<6x6xf32>
    %572 = vector.broadcast %570 : vector<1x6xf32> to vector<6x6xf32>
    %573 = arith.mulf %571, %572 : vector<6x6xf32>
    %574 = vector.extract_strided_slice %563 {offsets = [0, 2], sizes = [6, 1], strides = [1, 1]} : vector<6x6xf32> to vector<6x1xf32>
    %575 = vector.extract_strided_slice %522 {offsets = [2, 0], sizes = [1, 6], strides = [1, 1]} : vector<6x6xf32> to vector<1x6xf32>
    %576 = vector.broadcast %574 : vector<6x1xf32> to vector<6x6xf32>
    %577 = vector.broadcast %575 : vector<1x6xf32> to vector<6x6xf32>
    %578 = arith.mulf %576, %577 : vector<6x6xf32>
    %579 = vector.extract_strided_slice %563 {offsets = [0, 3], sizes = [6, 1], strides = [1, 1]} : vector<6x6xf32> to vector<6x1xf32>
    %580 = vector.extract_strided_slice %522 {offsets = [3, 0], sizes = [1, 6], strides = [1, 1]} : vector<6x6xf32> to vector<1x6xf32>
    %581 = vector.broadcast %579 : vector<6x1xf32> to vector<6x6xf32>
    %582 = vector.broadcast %580 : vector<1x6xf32> to vector<6x6xf32>
    %583 = arith.mulf %581, %582 : vector<6x6xf32>
    %584 = vector.extract_strided_slice %563 {offsets = [0, 4], sizes = [6, 1], strides = [1, 1]} : vector<6x6xf32> to vector<6x1xf32>
    %585 = vector.extract_strided_slice %522 {offsets = [4, 0], sizes = [1, 6], strides = [1, 1]} : vector<6x6xf32> to vector<1x6xf32>
    %586 = vector.broadcast %584 : vector<6x1xf32> to vector<6x6xf32>
    %587 = vector.broadcast %585 : vector<1x6xf32> to vector<6x6xf32>
    %588 = arith.mulf %586, %587 : vector<6x6xf32>
    %589 = vector.extract_strided_slice %563 {offsets = [0, 5], sizes = [6, 1], strides = [1, 1]} : vector<6x6xf32> to vector<6x1xf32>
    %590 = vector.extract_strided_slice %522 {offsets = [5, 0], sizes = [1, 6], strides = [1, 1]} : vector<6x6xf32> to vector<1x6xf32>
    %591 = vector.broadcast %589 : vector<6x1xf32> to vector<6x6xf32>
    %592 = vector.broadcast %590 : vector<1x6xf32> to vector<6x6xf32>
    %593 = arith.mulf %591, %592 : vector<6x6xf32>
    %594 = arith.addf %568, %573 : vector<6x6xf32>
    %595 = arith.addf %578, %583 : vector<6x6xf32>
    %596 = arith.addf %594, %595 : vector<6x6xf32>
    %597 = arith.addf %588, %593 : vector<6x6xf32>
    %598 = arith.addf %596, %597 : vector<6x6xf32>
    %c0_42 = arith.constant 0 : index
    %c0_43 = arith.constant 0 : index
    %599 = vector.load %arg4[%c0_42, %c0_43] : memref<6x6xf32, #tpu.memory_space<vmem>>, vector<6x6xf32>
    tpu.vector_store %arg4[%c0_42, %c0_43], %598 {strides = array<i32>} : memref<6x6xf32, #tpu.memory_space<vmem>>, vector<6x6xf32>,
    return
  }
  func.func @transform_0(%arg0: i32) -> (i32, i32, i32) {
    %c0_i32 = arith.constant 0 : i32
    %c0_i32_0 = arith.constant 0 : i32
    %c0_i32_1 = arith.constant 0 : i32
    %c0_i32_2 = arith.constant 0 : i32
    return %c0_i32, %c0_i32_0, %c0_i32_1 : i32, i32, i32
  }
  func.func @transform_1(%arg0: i32) -> (i32, i32, i32) {
    %c0_i32 = arith.constant 0 : i32
    %c0_i32_0 = arith.constant 0 : i32
    %c0_i32_1 = arith.constant 0 : i32
    %c0_i32_2 = arith.constant 0 : i32
    return %c0_i32, %c0_i32_0, %c0_i32_1 : i32, i32, i32
  }
  func.func @transform_2(%arg0: i32) -> (i32, i32) {
    %c0_i32 = arith.constant 0 : i32
    %c0_i32_0 = arith.constant 0 : i32
    %c0_i32_1 = arith.constant 0 : i32
    return %c0_i32, %c0_i32_0 : i32, i32
  }
  func.func @transform_3(%arg0: i32) -> (i32, i32) {
    %c0_i32 = arith.constant 0 : i32
    %c0_i32_0 = arith.constant 0 : i32
    %c0_i32_1 = arith.constant 0 : i32
    return %c0_i32, %c0_i32_0 : i32, i32
  }
}

</mosaic_0001>

<bundles_post_ra>
// kernel: tpu_custom_call.1
= control target key start
LH: loop header
LB: loop body
LE: loop exit
PB: predicated region body
PF: predicated region fallthrough
CT: control target
= control target key end

     0   :  { %v871_v1 = vmov 2   ;;  %v872_v2 = vmov 1   ;;  %s1211_s0 = inlined_call_operand.vmem [shape: f32[8,6,6], index: 0, kind: input, shape index: {}]   ;;  %s1212_s1 = inlined_call_operand.vmem [shape: f32[8,6,6], index: 1, kind: input, shape index: {}]   ;;  %s1213_s2 = inlined_call_operand.vmem [shape: f32[6,6], index: 2, kind: input, shape index: {}]   ;;  %s1214_s3 = inlined_call_operand.hbm [shape: f32[6,6], index: 3, kind: output, shape index: {}]  }
   0x1   :  { %v736_v0 = vld [vmem:[%s1211_s0 + $0x8] sm:$0x3f]  ;;  %758 = vset.pattern.permute.xlu1 %v871_v1  ;;  %757 = vset.pattern.permute.xlu0 %v872_v2 }
   0x2   :  { %60 = vperm.xlu1 %758, %v736_v0   ;;  %54 = vperm.xlu0 %757, %v736_v0  }
   0x3   :  { %8 = vsyncpa [#allocation3], 0  ;;  %v873_v3 = vmov 4   ;;  %v740_v4 = vld [vmem:[%s1211_s0 + $0x18] sm:$0x3f]  ;;  %v874_v5 = vmov 3  }
   0x4   :  { %760 = vset.pattern.permute.xlu2 %v873_v3  ;;  %v875_v6 = vmov 5   ;;  %v739_v7 = vld [vmem:[%s1212_s1 + $0x10] sm:$0x3f]  ;;  %v17_v8 = vld [vmem:[%s1212_s1] sm:$0x3f]  ;;  %v876_v9 = vmov 0  }
   0x5   :  { %72 = vperm.xlu2 %760, %v736_v0   ;;  %v924_v10 = vld [vmem:[%s1211_s0 + $0x38] sm:$0x3f]  ;;  %v941_v11 = vld [vmem:[%s1211_s0 + $0x28] sm:$0x3f]  ;;  %v954_v13 = vld [vmem:[%s1211_s0] sm:$0x3f] }
   0x6   :  { %v75_v14 = vperm.slane %v954_v13, 4  ;;  %v961_v15 = vld [vmem:[%s1212_s1 + $0x20] sm:$0x3f]  ;;  %v81_v16 = vperm.slane %v954_v13, 5  ;;  %v63_v25 = vperm.slane %v954_v13, 2  ;;  %v69_v26 = vperm.slane %v954_v13, 3 }
   0x7   :  { %v1001_v38 = vld [vmem:[%s1212_s1 + $0x30] sm:$0x3f]  ;;  %v57_v42 = vperm.slane %v954_v13, 1  ;;  %v51_v43 = vperm.slane %v954_v13, 0  ;;  %v1024_v49 = vld [vmem:[%s1212_s1 + $0x18] sm:$0x3f] }
   0x8   :  { %v738_v44 = vld [vmem:[%s1211_s0 + $0x10] sm:$0x3f]  ;;  %v207_v52 = vperm.slane %v1024_v49, 5  ;;  %v201_v57 = vperm.slane %v1024_v49, 4  ;;  %s727_s20 = sshll.u32 %s1214_s3, 4  ;;  %vm718_vm0 = vcmask 46080   ;;  %s728_s20 = int_to_ptr.hbm [resolvable:$true] %s727_s20 }
   0x9   :  { %v141_v48 = vperm.slane %v738_v44, 1  ;;  %v135_v50 = vperm.slane %v738_v44, 0  ;;  %v153_v53 = vperm.slane %v738_v44, 3  ;;  %v147_v54 = vperm.slane %v738_v44, 2 }
   0xa   :  { %759 = vset.pattern.permute.xlu1 %v874_v5  ;;  %138 = vperm.xlu0 %757, %v740_v4  }
   0xb   :  { %66 = vperm.xlu1 %759, %v736_v0  }
   0xd   :  { %761 = vset.pattern.permute.xlu2 %v875_v6 }
   0xe   :  { %78 = vperm.xlu2 %761, %v736_v0  }
  0x12   :  { %776 = vset.pattern.permute.xlu0 %v875_v6 }
  0x13   :  { %762 = vset.pattern.permute.xlu1 %v876_v9  ;;  %204 = vperm.xlu0 %776, %v739_v7  }
  0x14   :  { %90 = vperm.xlu1 %762, %v17_v8  }
  0x16   :  { %763 = vset.pattern.permute.xlu2 %v872_v2 }
  0x17   :  { %96 = vperm.xlu2 %763, %v17_v8  }
  0x1b   :  { %777 = vset.pattern.permute.xlu0 %v871_v1 }
  0x1c   :  { %102 = vperm.xlu0 %777, %v17_v8   ;;  %764 = vset.pattern.permute.xlu1 %v874_v5 }
  0x1d   :  { %108 = vperm.xlu1 %764, %v17_v8  }
  0x1f   :  { %765 = vset.pattern.permute.xlu2 %v873_v3 }
  0x20   :  { %114 = vperm.xlu2 %765, %v17_v8  }
  0x24   :  { %312 = vperm.xlu0 %777, %v924_v10  }
  0x25   :  { %766 = vset.pattern.permute.xlu1 %v875_v6 }
  0x26   :  { %120 = vperm.xlu1 %766, %v17_v8   ;;  %v159_v8 = vperm.slane %v738_v44, 4 }
  0x28   :  { %767 = vset.pattern.permute.xlu2 %v876_v9 }
  0x29   :  { %132 = vperm.xlu2 %767, %v740_v4  }
  0x2c   :  { %790 = vset.pattern.permute.xlu0 %v876_v9 }
  0x2d   :  { %48 = vperm.xlu0 %790, %v736_v0   ;;  %v165_v0 = vperm.slane %v738_v44, 5 }
  0x2e   :  { %768 = vset.pattern.permute.xlu1 %v871_v1 }
  0x2f   :  { %144 = vperm.xlu1 %768, %v740_v4  }
  0x31   :  { %769 = vset.pattern.permute.xlu2 %v874_v5 }
  0x32   :  { %150 = vperm.xlu2 %769, %v740_v4  }
  0x35   :  { %174 = vperm.xlu0 %790, %v739_v7  }
  0x37   :  { %770 = vset.pattern.permute.xlu1 %v873_v3 }
  0x38   :  { %156 = vperm.xlu1 %770, %v740_v4  }
  0x3a   :  { %771 = vset.pattern.permute.xlu2 %v875_v6 }
  0x3b   :  { %162 = vperm.xlu2 %771, %v740_v4  }
  0x40   :  { %772 = vset.pattern.permute.xlu1 %v872_v2 }
  0x41   :  { %180 = vperm.xlu1 %772, %v739_v7  }
  0x43   :  { %773 = vset.pattern.permute.xlu2 %v871_v1 }
  0x44   :  { %186 = vperm.xlu2 %773, %v739_v7  }
  0x49   :  { %774 = vset.pattern.permute.xlu1 %v874_v5 }
  0x4a   :  { %192 = vperm.xlu1 %774, %v739_v7  }
  0x4c   :  { %775 = vset.pattern.permute.xlu2 %v873_v3 }
  0x4d   :  { %198 = vperm.xlu2 %775, %v739_v7  }
  0x52   :  { %778 = vset.pattern.permute.xlu1 %v876_v9 }
  0x53   :  { %216 = vperm.xlu1 %778, %v941_v11  }
  0x55   :  { %779 = vset.pattern.permute.xlu2 %v872_v2 }
  0x56   :  { %222 = vperm.xlu2 %779, %v941_v11  }
  0x5b   :  { %780 = vset.pattern.permute.xlu1 %v871_v1 }
  0x5c   :  { %228 = vperm.xlu1 %780, %v941_v11  }
  0x5e   :  { %781 = vset.pattern.permute.xlu2 %v874_v5 }
  0x5f   :  { %234 = vperm.xlu2 %781, %v941_v11   ;;  %v73_v12 = vpop.permute.xlu2 %72 }
  0x60   :  { %v76_v17 = vmul.f32 %v75_v14, %v73_v12 }
  0x64   :  { %782 = vset.pattern.permute.xlu1 %v875_v6 }
  0x65   :  { %246 = vperm.xlu1 %782, %v941_v11  }
  0x67   :  { %783 = vset.pattern.permute.xlu2 %v876_v9 }
  0x68   :  { %258 = vperm.xlu2 %783, %v961_v15   ;;  %v79_v18 = vpop.permute.xlu2 %78 }
  0x69   :  { %v82_v19 = vmul.f32 %v81_v16, %v79_v18 }
  0x6b   :  { %v967_v20 = vadd.f32 %v82_v19, %v76_v17 }
  0x6d   :  { %784 = vset.pattern.permute.xlu1 %v872_v2 }
  0x6e   :  { %264 = vperm.xlu1 %784, %v961_v15  }
  0x70   :  { %785 = vset.pattern.permute.xlu2 %v871_v1 }
  0x71   :  { %270 = vperm.xlu2 %785, %v961_v15   ;;  %v973_v21 = vpop.permute.xlu2 %96 }
  0x74   :  { %v61_v22 = vpop.permute.xlu1 %60  ;;  %v55_v23 = vpop.permute.xlu0 %54 }
  0x75   :  { %v64_v29 = vmul.f32 %v63_v25, %v61_v22  ;;  %v58_v46 = vmul.f32 %v57_v42, %v55_v23  ;;  %v737_v25 = vld [vmem:[%s1212_s1 + $0x8] sm:$0x3f] }
  0x76   :  { %786 = vset.pattern.permute.xlu1 %v873_v3 }
  0x77   :  { %282 = vperm.xlu1 %786, %v961_v15  }
  0x79   :  { %787 = vset.pattern.permute.xlu2 %v875_v6 }
  0x7a   :  { %288 = vperm.xlu2 %787, %v961_v15   ;;  %v979_v24 = vpop.permute.xlu2 %114 }
  0x7c   :  { %v139_v27 = vpop.permute.xlu0 %138 }
  0x7d   :  { %v67_v28 = vpop.permute.xlu1 %66  ;;  %v142_v58 = vmul.f32 %v141_v48, %v139_v27  ;;  %v105_v27 = vperm.slane %v737_v25, 2  ;;  %v195_v48 = vperm.slane %v1024_v49, 3 }
  0x7e   :  { %v70_v30 = vmul.f32 %v69_v26, %v67_v28  ;;  %v111_v28 = vperm.slane %v737_v25, 3 }
  0x7f   :  { %788 = vset.pattern.permute.xlu1 %v876_v9 }
  0x80   :  { %v84_v31 = vadd.f32 %v70_v30, %v64_v29  ;;  %300 = vperm.xlu1 %788, %v924_v10   ;;  %v99_v29 = vperm.slane %v737_v25, 1  ;;  %v93_v30 = vperm.slane %v737_v25, 0 }
  0x82   :  { %789 = vset.pattern.permute.xlu2 %v872_v2 }
  0x83   :  { %306 = vperm.xlu2 %789, %v924_v10   ;;  %v133_v32 = vpop.permute.xlu2 %132 }
  0x84   :  { %v136_v59 = vmul.f32 %v135_v50, %v133_v32  ;;  %v123_v32 = vperm.slane %v737_v25, 5 }
  0x85   :  { %v205_v33 = vpop.permute.xlu0 %204 }
  0x86   :  { %v987_v34 = vpop.permute.xlu1 %90  ;;  %v208_v61 = vmul.f32 %v207_v52, %v205_v33  ;;  %v167_v12 = vadd.f32 %v142_v58, %v136_v59  ;;  %v189_v33 = vperm.slane %v1024_v49, 2 }
  0x87   :  { %v94_v50 = vmul.f32 %v93_v30, %v987_v34 }
  0x88   :  { %791 = vset.pattern.permute.xlu1 %v874_v5 }
  0x89   :  { %318 = vperm.xlu1 %791, %v924_v10  }
  0x8b   :  { %792 = vset.pattern.permute.xlu2 %v873_v3 }
  0x8c   :  { %324 = vperm.xlu2 %792, %v924_v10   ;;  %v151_v35 = vpop.permute.xlu2 %150 }
  0x8d   :  { %v154_v62 = vmul.f32 %v153_v53, %v151_v35  ;;  %v177_v35 = vperm.slane %v1024_v49, 0 }
  0x8e   :  { %v993_v36 = vpop.permute.xlu0 %102 }
  0x8f   :  { %v995_v37 = vpop.permute.xlu1 %108  ;;  %v106_v42 = vmul.f32 %v105_v27, %v993_v36 }
  0x91   :  { %793 = vset.pattern.permute.xlu1 %v875_v6 }
  0x92   :  { %330 = vperm.xlu1 %793, %v924_v10  }
  0x94   :  { %794 = vset.pattern.permute.xlu2 %v876_v9 }
  0x95   :  { %342 = vperm.xlu2 %794, %v1001_v38   ;;  %v163_v39 = vpop.permute.xlu2 %162 }
  0x96   :  { %v1006_v40 = vpop.permute.xlu0 %312  ;;  %v166_v14 = vmul.f32 %v165_v0, %v163_v39  ;;  %v183_v39 = vperm.slane %v1024_v49, 1  ;;  %v1057_v49 = vld [vmem:[%s1211_s0 + $0x20] sm:$0x3f] }
  0x97   :  { %v225_v58 = vperm.slane %v1057_v49, 1 }
  0x98   :  { %v1008_v41 = vpop.permute.xlu1 %120 }
  0x99   :  { %v124_v52 = vmul.f32 %v123_v32, %v1008_v41 }
  0x9a   :  { %795 = vset.pattern.permute.xlu1 %v871_v1 }
  0x9b   :  { %354 = vperm.xlu1 %795, %v1001_v38  }
  0x9d   :  { %796 = vset.pattern.permute.xlu2 %v874_v5 }
  0x9e   :  { %360 = vperm.xlu2 %796, %v1001_v38   ;;  %v1019_v45 = vpop.permute.xlu2 %186 }
  0x9f   :  { %v49_v47 = vpop.permute.xlu0 %48  ;;  %v190_v36 = vmul.f32 %v189_v33, %v1019_v45 }
  0xa0   :  { %v52_v51 = vmul.f32 %v51_v43, %v49_v47  ;;  %v112_v43 = vmul.f32 %v111_v28, %v995_v37  ;;  %v100_v47 = vmul.f32 %v99_v29, %v973_v21 }
  0xa1   :  { %v145_v55 = vpop.permute.xlu1 %144 }
  0xa2   :  { %v83_v56 = vadd.f32 %v58_v46, %v52_v51  ;;  %v148_v63 = vmul.f32 %v147_v54, %v145_v55  ;;  %v126_v21 = vadd.f32 %v112_v43, %v106_v42 }
  0xa3   :  { %797 = vset.pattern.permute.xlu1 %v873_v3 }
  0xa4   :  { %v85_v60 = vadd.f32 %v84_v31, %v83_v56  ;;  %366 = vperm.xlu1 %797, %v1001_v38   ;;  %v168_v13 = vadd.f32 %v154_v62, %v148_v63  ;;  %v117_v31 = vperm.slane %v737_v25, 4 }
  0xa6   :  { %798 = vset.pattern.permute.xlu2 %v875_v6  ;;  %v1032_v4 = vadd.f32 %v967_v20, %v85_v60  ;;  %v169_v19 = vadd.f32 %v168_v13, %v167_v12  ;;  %v118_v51 = vmul.f32 %v117_v31, %v979_v24  ;;  %v125_v24 = vadd.f32 %v100_v47, %v94_v50  ;;  %v746_v47 = vld [vmem:[%s1211_s0 + $0x30] sm:$0x3f] }
  0xa7   :  { %372 = vperm.xlu2 %798, %v1001_v38   ;;  %v199_v7 = vpop.permute.xlu2 %198  ;;  %v175_v44 = vpop.permute.xlu0 %174  ;;  %v231_v13 = vperm.slane %v1057_v49, 2 }
  0xa8   :  { %v202_v10 = vmul.f32 %v201_v57, %v199_v7  ;;  %v178_v37 = vmul.f32 %v177_v35, %v175_v44  ;;  %v128_v55 = vadd.f32 %v124_v52, %v118_v51  ;;  %v127_v57 = vadd.f32 %v126_v21, %v125_v24 }
  0xa9   :  { %v315_v51 = vperm.slane %v746_v47, 2  ;;  %v309_v52 = vperm.slane %v746_v47, 1 }
  0xaa   :  { %v212_v16 = vadd.f32 %v208_v61, %v202_v10  ;;  %v157_v17 = vpop.permute.xlu1 %156  ;;  %v129_v60 = vadd.f32 %v128_v55, %v127_v57  ;;  %v219_v61 = vperm.slane %v1057_v49, 0  ;;  %v237_v10 = vperm.slane %v1057_v49, 3 }
  0xab   :  { %v160_v18 = vmul.f32 %v159_v8, %v157_v17  ;;  %v316_v21 = vmul.f32 %v315_v51, %v1006_v40  ;;  %v333_v55 = vperm.slane %v746_v47, 5  ;;  %v399_v40 = vperm.slane %v1032_v4, 2 }
  0xac   :  { %799 = vset.pattern.permute.xlu1 %v872_v2 }
  0xad   :  { %v170_v22 = vadd.f32 %v166_v14, %v160_v18 }
  0xaf   :  { %800 = vset.pattern.permute.xlu2 %v871_v1  ;;  %v171_v23 = vadd.f32 %v170_v22, %v169_v19 }
  0xb0   :  { %v223_v20 = vpop.permute.xlu2 %222 }
  0xb1   :  { %396 = vperm.xlu2 %800, %v171_v23   ;;  %390 = vperm.xlu1 %799, %v171_v23   ;;  %v226_v63 = vmul.f32 %v225_v58, %v223_v20 }
  0xb2   :  { %384 = vperm.xlu0 %790, %v171_v23  }
  0xb3   :  { %v181_v26 = vpop.permute.xlu1 %180 }
  0xb4   :  { %v184_v53 = vmul.f32 %v183_v39, %v181_v26 }
  0xb6   :  { %v209_v41 = vadd.f32 %v184_v53, %v178_v37  ;;  %v327_v37 = vperm.slane %v746_v47, 4 }
  0xb9   :  { %v235_v46 = vpop.permute.xlu2 %234  ;;  %802 = vset.pattern.permute.xlu2 %v873_v3  ;;  %801 = vset.pattern.permute.xlu1 %v874_v5 }
  0xba   :  { %803 = vset.pattern.permute.xlu0 %v875_v6  ;;  %408 = vperm.xlu2 %802, %v171_v23   ;;  %v238_v14 = vmul.f32 %v237_v10, %v235_v46 }
  0xbb   :  { %402 = vperm.xlu1 %801, %v171_v23   ;;  %414 = vperm.xlu0 %803, %v171_v23   ;;  %v1084_v23 = vld [vmem:[%s1212_s1 + $0x28] sm:$0x3f] }
  0xbc   :  { %v193_v54 = vpop.permute.xlu1 %192  ;;  %v261_v20 = vperm.slane %v1084_v23, 0  ;;  %v267_v26 = vperm.slane %v1084_v23, 1  ;;  %v285_v32 = vperm.slane %v1084_v23, 4 }
  0xbd   :  { %v196_v34 = vmul.f32 %v195_v48, %v193_v54  ;;  %v321_v48 = vperm.slane %v746_v47, 3 }
  0xbf   :  { %v210_v56 = vadd.f32 %v196_v34, %v190_v36  ;;  %v303_v36 = vperm.slane %v746_v47, 0  ;;  %v405_v47 = vperm.slane %v1032_v4, 3 }
  0xc1   :  { %v211_v45 = vadd.f32 %v210_v56, %v209_v41 }
  0xc2   :  { %v259_v59 = vpop.permute.xlu2 %258  ;;  %806 = vset.pattern.permute.xlu2 %v872_v2 }
  0xc3   :  { %v1062_v62 = vadd.f32 %v212_v16, %v211_v45  ;;  %805 = vset.pattern.permute.xlu1 %v876_v9  ;;  %804 = vset.pattern.permute.xlu0 %v873_v3  ;;  %v262_v27 = vmul.f32 %v261_v20, %v259_v59  ;;  %v1104_v59 = vld [vmem:[%s1212_s1 + $0x38] sm:$0x3f] }
  0xc4   :  { %432 = vperm.xlu2 %806, %v129_v60   ;;  %426 = vperm.xlu1 %805, %v129_v60   ;;  %v369_v20 = vperm.slane %v1104_v59, 4 }
  0xc5   :  { %240 = vperm.xlu0 %804, %v941_v11   ;;  %v217_v0 = vpop.permute.xlu1 %216 }
  0xc6   :  { %v220_v7 = vmul.f32 %v219_v61, %v217_v0 }
  0xc8   :  { %v251_v8 = vadd.f32 %v226_v63, %v220_v7  ;;  %v363_v63 = vperm.slane %v1104_v59, 3  ;;  %v357_v7 = vperm.slane %v1104_v59, 2 }
  0xcb   :  { %v1068_v12 = vpop.permute.xlu2 %270 }
  0xcc   :  { %808 = vset.pattern.permute.xlu2 %v874_v5  ;;  %807 = vset.pattern.permute.xlu1 %v871_v1 }
  0xcd   :  { %450 = vperm.xlu0 %804, %v129_v60   ;;  %444 = vperm.xlu2 %808, %v129_v60  }
  0xce   :  { %438 = vperm.xlu1 %807, %v129_v60   ;;  %v229_v16 = vpop.permute.xlu1 %228 }
  0xcf   :  { %v232_v17 = vmul.f32 %v231_v13, %v229_v16 }
  0xd1   :  { %v252_v11 = vadd.f32 %v238_v14, %v232_v17 }
  0xd3   :  { %v1073_v18 = vadd.f32 %v252_v11, %v251_v8  ;;  %v375_v11 = vperm.slane %v1104_v59, 5 }
  0xd4   :  { %v289_v19 = vpop.permute.xlu2 %288 }
  0xd5   :  { %809 = vset.pattern.permute.xlu0 %v874_v5  ;;  %811 = vset.pattern.permute.xlu2 %v876_v9 }
  0xd6   :  { %810 = vset.pattern.permute.xlu1 %v875_v6  ;;  %276 = vperm.xlu0 %809, %v961_v15   ;;  %v291_v15 = vperm.slane %v1084_v23, 5 }
  0xd7   :  { %456 = vperm.xlu1 %810, %v129_v60   ;;  %v1079_v22 = vpop.permute.xlu1 %246 }
  0xd8   :  { %v292_v33 = vmul.f32 %v291_v15, %v289_v19  ;;  %v411_v19 = vperm.slane %v1032_v4, 4 }
  0xdd   :  { %v307_v25 = vpop.permute.xlu2 %306 }
  0xde   :  { %v310_v54 = vmul.f32 %v309_v52, %v307_v25 }
  0xdf   :  { %812 = vset.pattern.permute.xlu1 %v872_v2 }
  0xe0   :  { %v265_v28 = vpop.permute.xlu1 %264 }
  0xe1   :  { %v268_v29 = vmul.f32 %v267_v26, %v265_v28 }
  0xe3   :  { %v1089_v30 = vadd.f32 %v268_v29, %v262_v27 }
  0xe6   :  { %v325_v31 = vpop.permute.xlu2 %324 }
  0xe7   :  { %v328_v41 = vmul.f32 %v327_v37, %v325_v31  ;;  %v393_v31 = vperm.slane %v1032_v4, 1 }
  0xe9   :  { %v283_v35 = vpop.permute.xlu1 %282 }
  0xea   :  { %v286_v39 = vmul.f32 %v285_v32, %v283_v35  ;;  %v387_v32 = vperm.slane %v1032_v4, 0 }
  0xec   :  { %v1093_v42 = vadd.f32 %v292_v33, %v286_v39 }
  0xef   :  { %v1095_v43 = vpop.permute.xlu2 %342 }
  0xf2   :  { %v301_v44 = vpop.permute.xlu1 %300 }
  0xf3   :  { %v304_v34 = vmul.f32 %v303_v36, %v301_v44 }
  0xf5   :  { %v335_v58 = vadd.f32 %v310_v54, %v304_v34  ;;  %v243_v34 = vperm.slane %v1057_v49, 4 }
  0xf8   :  { %v361_v46 = vpop.permute.xlu2 %360 }
  0xf9   :  { %v364_v10 = vmul.f32 %v363_v63, %v361_v46  ;;  %v417_v46 = vperm.slane %v1032_v4, 5 }
  0xfb   :  { %v319_v50 = vpop.permute.xlu1 %318 }
  0xfc   :  { %v322_v53 = vmul.f32 %v321_v48, %v319_v50 }
  0xfe   :  { %v336_v56 = vadd.f32 %v322_v53, %v316_v21  ;;  %v249_v21 = vperm.slane %v1057_v49, 5  ;;  %v447_v49 = vperm.slane %v1062_v62, 3 }
 0x100   :  { %v337_v60 = vadd.f32 %v336_v56, %v335_v58 }
 0x101   :  { %v373_v24 = vpop.permute.xlu2 %372 }
 0x102   :  { %v376_v26 = vmul.f32 %v375_v11, %v373_v24 }
 0x104   :  { %v331_v57 = vpop.permute.xlu1 %330 }
 0x105   :  { %v334_v45 = vmul.f32 %v333_v55, %v331_v57 }
 0x107   :  { %v338_v61 = vadd.f32 %v334_v45, %v328_v41  ;;  %v250_v41 = vmul.f32 %v249_v21, %v1079_v22  ;;  %v453_v45 = vperm.slane %v1062_v62, 4  ;;  %v273_v22 = vperm.slane %v1084_v23, 2 }
 0x109   :  { %v339_v0 = vadd.f32 %v338_v61, %v337_v60 }
 0x10b   :  { %v397_v8 = vpop.permute.xlu2 %396  ;;  %486 = vperm.xlu0 %809, %v339_v0   ;;  %474 = vperm.xlu1 %812, %v339_v0  }
 0x10c   :  { %v400_v13 = vmul.f32 %v399_v40, %v397_v8  ;;  %468 = vperm.xlu2 %811, %v339_v0  }
 0x10d   :  { %v355_v14 = vpop.permute.xlu1 %354 }
 0x10e   :  { %v358_v16 = vmul.f32 %v357_v7, %v355_v14  ;;  %v429_v7 = vperm.slane %v1062_v62, 0 }
 0x110   :  { %v1109_v17 = vadd.f32 %v364_v10, %v358_v16  ;;  %v279_v10 = vperm.slane %v1084_v23, 3 }
 0x113   :  { %814 = vset.pattern.permute.xlu0 %v872_v2  ;;  %815 = vset.pattern.permute.xlu1 %v873_v3 }
 0x114   :  { %813 = vset.pattern.permute.xlu2 %v871_v1  ;;  %v409_v25 = vpop.permute.xlu2 %408  ;;  %348 = vperm.xlu0 %814, %v1001_v38  }
 0x115   :  { %v412_v27 = vmul.f32 %v411_v19, %v409_v25  ;;  %492 = vperm.xlu1 %815, %v339_v0   ;;  %480 = vperm.xlu2 %813, %v339_v0   ;;  %v274_v25 = vmul.f32 %v273_v22, %v1068_v12 }
 0x116   :  { %v367_v28 = vpop.permute.xlu1 %366 }
 0x117   :  { %v370_v29 = vmul.f32 %v369_v20, %v367_v28  ;;  %v459_v20 = vperm.slane %v1062_v62, 5 }
 0x119   :  { %v1118_v15 = vadd.f32 %v376_v26, %v370_v29 }
 0x11d   :  { %816 = vset.pattern.permute.xlu2 %v875_v6  ;;  %817 = vset.pattern.permute.xlu1 %v876_v9 }
 0x11e   :  { %498 = vperm.xlu2 %816, %v339_v0   ;;  %v433_v57 = vpop.permute.xlu2 %432  ;;  %v441_v0 = vperm.slane %v1062_v62, 2 }
 0x123   :  { %v391_v33 = vpop.permute.xlu1 %390 }
 0x124   :  { %v385_v35 = vpop.permute.xlu0 %384  ;;  %v394_v38 = vmul.f32 %v393_v31, %v391_v33 }
 0x125   :  { %v388_v39 = vmul.f32 %v387_v32, %v385_v35 }
 0x126   :  { %818 = vset.pattern.permute.xlu2 %v872_v2 }
 0x127   :  { %v419_v44 = vadd.f32 %v394_v38, %v388_v39  ;;  %v445_v40 = vpop.permute.xlu2 %444 }
 0x12d   :  { %v415_v48 = vpop.permute.xlu0 %414  ;;  %v403_v50 = vpop.permute.xlu1 %402 }
 0x12e   :  { %v418_v51 = vmul.f32 %v417_v46, %v415_v48  ;;  %v406_v52 = vmul.f32 %v405_v47, %v403_v50 }
 0x130   :  { %v422_v36 = vadd.f32 %v418_v51, %v412_v27  ;;  %v420_v37 = vadd.f32 %v406_v52, %v400_v13  ;;  %v448_v13 = vmul.f32 %v447_v49, %v445_v40  ;;  %v345_v51 = vperm.slane %v1104_v59, 0 }
 0x131   :  { %v351_v52 = vperm.slane %v1104_v59, 1 }
 0x132   :  { %v421_v53 = vadd.f32 %v420_v37, %v419_v44 }
 0x134   :  { %v1128_v54 = vadd.f32 %v422_v36, %v421_v53 }
 0x136   :  { %v427_v24 = vpop.permute.xlu1 %426 }
 0x137   :  { %v241_v55 = vpop.permute.xlu0 %240  ;;  %v430_v14 = vmul.f32 %v429_v7, %v427_v24 }
 0x138   :  { %v244_v56 = vmul.f32 %v243_v34, %v241_v55 }
 0x13a   :  { %v254_v4 = vadd.f32 %v250_v41, %v244_v56  ;;  %v346_v56 = vmul.f32 %v345_v51, %v1095_v43 }
 0x13c   :  { %v1133_v58 = vadd.f32 %v254_v4, %v1073_v18  ;;  %v435_v18 = vperm.slane %v1062_v62, 1 }
 0x13e   :  { %v436_v16 = vmul.f32 %v435_v18, %v433_v57  ;;  %v477_v44 = vperm.slane %v1133_v58, 1  ;;  %v471_v46 = vperm.slane %v1133_v58, 0  ;;  %v483_v47 = vperm.slane %v1133_v58, 2 }
 0x13f   :  { %v451_v60 = vpop.permute.xlu0 %450  ;;  %v501_v21 = vperm.slane %v1133_v58, 5  ;;  %v495_v41 = vperm.slane %v1133_v58, 4 }
 0x140   :  { %v454_v61 = vmul.f32 %v453_v45, %v451_v60  ;;  %v439_v63 = vpop.permute.xlu1 %438  ;;  %v461_v28 = vadd.f32 %v436_v16, %v430_v14 }
 0x141   :  { %v442_v8 = vmul.f32 %v441_v0, %v439_v63 }
 0x143   :  { %v462_v11 = vadd.f32 %v448_v13, %v442_v8 }
 0x145   :  { %v463_v32 = vadd.f32 %v462_v11, %v461_v28 }
 0x148   :  { %v277_v19 = vpop.permute.xlu0 %276 }
 0x149   :  { %v280_v26 = vmul.f32 %v279_v10, %v277_v19  ;;  %v457_v27 = vpop.permute.xlu1 %456 }
 0x14a   :  { %v460_v29 = vmul.f32 %v459_v20, %v457_v27 }
 0x14b   :  { %v294_v31 = vadd.f32 %v280_v26, %v274_v25 }
 0x14c   :  { %v464_v33 = vadd.f32 %v460_v29, %v454_v61 }
 0x14d   :  { %v295_v23 = vadd.f32 %v294_v31, %v1089_v30 }
 0x14e   :  { %v1145_v35 = vadd.f32 %v464_v33, %v463_v32  ;;  %v561_v32 = vperm.slane %v1128_v54, 1  ;;  %v567_v33 = vperm.slane %v1128_v54, 2 }
 0x14f   :  { %v297_v38 = vadd.f32 %v1093_v42, %v295_v23  ;;  %v489_v42 = vperm.slane %v1133_v58, 3  ;;  %v555_v23 = vperm.slane %v1128_v54, 0 }
 0x151   :  { %510 = vperm.xlu1 %817, %v297_v38   ;;  %516 = vperm.xlu2 %818, %v297_v38  }
 0x159   :  { %819 = vset.pattern.permute.xlu1 %v874_v5  ;;  %820 = vset.pattern.permute.xlu2 %v873_v3 }
 0x15a   :  { %528 = vperm.xlu1 %819, %v297_v38   ;;  %534 = vperm.xlu2 %820, %v297_v38  }
 0x162   :  { %821 = vset.pattern.permute.xlu1 %v875_v6  ;;  %822 = vset.pattern.permute.xlu2 %v876_v9 }
 0x163   :  { %540 = vperm.xlu1 %821, %v297_v38  }
 0x166   :  { %v469_v62 = vpop.permute.xlu2 %468 }
 0x167   :  { %v472_v36 = vmul.f32 %v471_v46, %v469_v62 }
 0x16b   :  { %823 = vset.pattern.permute.xlu1 %v871_v1 }
 0x16f   :  { %v481_v12 = vpop.permute.xlu2 %480 }
 0x170   :  { %v484_v37 = vmul.f32 %v483_v47, %v481_v12 }
 0x178   :  { %v499_v53 = vpop.permute.xlu2 %498 }
 0x179   :  { %v502_v45 = vmul.f32 %v501_v21, %v499_v53 }
 0x17d   :  { %v487_v30 = vpop.permute.xlu0 %486  ;;  %v475_v39 = vpop.permute.xlu1 %474 }
 0x17e   :  { %v490_v48 = vmul.f32 %v489_v42, %v487_v30  ;;  %v478_v50 = vmul.f32 %v477_v44, %v475_v39  ;;  %v585_v44 = vperm.slane %v1128_v54, 5 }
 0x180   :  { %v504_v34 = vadd.f32 %v490_v48, %v484_v37  ;;  %v503_v24 = vadd.f32 %v478_v50, %v472_v36  ;;  %v579_v48 = vperm.slane %v1128_v54, 4 }
 0x182   :  { %v505_v63 = vadd.f32 %v504_v34, %v503_v24 }
 0x186   :  { %v349_v55 = vpop.permute.xlu0 %348 }
 0x187   :  { %v352_v57 = vmul.f32 %v351_v52, %v349_v55  ;;  %v493_v4 = vpop.permute.xlu1 %492 }
 0x188   :  { %v496_v60 = vmul.f32 %v495_v41, %v493_v4 }
 0x189   :  { %v377_v61 = vadd.f32 %v352_v57, %v346_v56 }
 0x18a   :  { %v506_v0 = vadd.f32 %v502_v45, %v496_v60 }
 0x18b   :  { %v379_v59 = vadd.f32 %v1109_v17, %v377_v61 }
 0x18c   :  { %v507_v40 = vadd.f32 %v506_v0, %v505_v63 }
 0x18d   :  { %v1164_v49 = vadd.f32 %v1118_v15, %v379_v59 }
 0x18e   :  { %564 = vperm.xlu1 %823, %v507_v40   ;;  %558 = vperm.xlu0 %814, %v507_v40  }
 0x18f   :  { %552 = vperm.xlu2 %822, %v507_v40   ;;  %v519_v43 = vperm.slane %v1164_v49, 1  ;;  %v537_v58 = vperm.slane %v1164_v49, 4  ;;  %v513_v22 = vperm.slane %v1164_v49, 0  ;;  %v531_v14 = vperm.slane %v1164_v49, 3 }
 0x190   :  { %v543_v19 = vperm.slane %v1164_v49, 5  ;;  %v525_v34 = vperm.slane %v1164_v49, 2 }
 0x196   :  { %825 = vset.pattern.permute.xlu1 %v873_v3  ;;  %827 = vset.pattern.permute.xlu0 %v876_v9 }
 0x197   :  { %824 = vset.pattern.permute.xlu2 %v874_v5  ;;  %576 = vperm.xlu1 %825, %v507_v40  }
 0x198   :  { %594 = vperm.xlu0 %827, %v1145_v35   ;;  %570 = vperm.xlu2 %824, %v507_v40  }
 0x19f   :  { %829 = vset.pattern.permute.xlu1 %v872_v2 }
 0x1a0   :  { %828 = vset.pattern.permute.xlu0 %v871_v1  ;;  %826 = vset.pattern.permute.xlu2 %v875_v6 }
 0x1a1   :  { %600 = vperm.xlu1 %829, %v1145_v35   ;;  %522 = vperm.xlu0 %828, %v297_v38   ;;  %v573_v38 = vperm.slane %v1128_v54, 3 }
 0x1a2   :  { %582 = vperm.xlu2 %826, %v507_v40  }
 0x1a9   :  { %831 = vset.pattern.permute.xlu1 %v876_v9 }
 0x1aa   :  { %830 = vset.pattern.permute.xlu2 %v871_v1 }
 0x1ab   :  { %606 = vperm.xlu2 %830, %v1145_v35   ;;  %v517_v17 = vpop.permute.xlu2 %516 }
 0x1ac   :  { %v520_v15 = vmul.f32 %v519_v43, %v517_v17 }
 0x1b3   :  { %832 = vset.pattern.permute.xlu2 %v872_v2 }
 0x1b4   :  { %v535_v7 = vpop.permute.xlu2 %534 }
 0x1b5   :  { %v538_v8 = vmul.f32 %v537_v58, %v535_v7 }
 0x1c3   :  { %v511_v10 = vpop.permute.xlu1 %510 }
 0x1c4   :  { %v514_v18 = vmul.f32 %v513_v22, %v511_v10  ;;  %v15_v22 = vld [vmem:[%s1213_s2] sm:$0x3f]  ;;  %s877_s2 = smov [#allocation2]  }
 0x1c5   :  { %v637_v10 = vperm.slane %v15_v22, 3  ;;  %s725_s17 = sshll.u32 %s877_s2, 4  ;;  %s726_s17 = int_to_ptr.vmem [resolvable:$true] %s725_s17 }
 0x1c6   :  { %v545_v13 = vadd.f32 %v520_v15, %v514_v18  ;;  %v634_v18 = vperm.slane %v15_v22, 0 }
 0x1cc   :  { %v529_v16 = vpop.permute.xlu1 %528 }
 0x1cd   :  { %v532_v11 = vmul.f32 %v531_v14, %v529_v16  ;;  %v638_v16 = vperm.slane %v15_v22, 4 }
 0x1d5   :  { %v541_v20 = vpop.permute.xlu1 %540 }
 0x1d6   :  { %v544_v25 = vmul.f32 %v543_v19, %v541_v20  ;;  %v639_v20 = vperm.slane %v15_v22, 5 }
 0x1d8   :  { %v548_v26 = vadd.f32 %v544_v25, %v538_v8 }
 0x1e9   :  { %v553_v27 = vpop.permute.xlu2 %552 }
 0x1ea   :  { %v556_v30 = vmul.f32 %v555_v23, %v553_v27 }
 0x1f2   :  { %v571_v28 = vpop.permute.xlu2 %570 }
 0x1f3   :  { %v574_v39 = vmul.f32 %v573_v38, %v571_v28 }
 0x1fc   :  { %v583_v42 = vpop.permute.xlu2 %582 }
 0x1fd   :  { %v586_v51 = vmul.f32 %v585_v44, %v583_v42 }
 0x200   :  { %v559_v29 = vpop.permute.xlu0 %558  ;;  %v565_v31 = vpop.permute.xlu1 %564 }
 0x201   :  { %v562_v62 = vmul.f32 %v561_v32, %v559_v29  ;;  %v568_v12 = vmul.f32 %v567_v33, %v565_v31 }
 0x203   :  { %v587_v46 = vadd.f32 %v562_v62, %v556_v30  ;;  %v588_v47 = vadd.f32 %v574_v39, %v568_v12 }
 0x205   :  { %v589_v37 = vadd.f32 %v588_v47, %v587_v46  ;;  %v607_v0 = vpop.permute.xlu2 %606 }
 0x209   :  { %v577_v50 = vpop.permute.xlu1 %576 }
 0x20a   :  { %v595_v52 = vpop.permute.xlu0 %594  ;;  %v580_v36 = vmul.f32 %v579_v48, %v577_v50 }
 0x20c   :  { %v590_v53 = vadd.f32 %v586_v51, %v580_v36 }
 0x20e   :  { %v591_v21 = vadd.f32 %v590_v53, %v589_v37 }
 0x210   :  { %652 = vperm.xlu0 %828, %v591_v21   ;;  %647 = vperm.xlu2 %832, %v591_v21  }
 0x211   :  { %642 = vperm.xlu1 %831, %v591_v21  }
 0x213   :  { %v523_v24 = vpop.permute.xlu0 %522  ;;  %v601_v45 = vpop.permute.xlu1 %600 }
 0x214   :  { %v526_v55 = vmul.f32 %v525_v34, %v523_v24 }
 0x216   :  { %v546_v41 = vadd.f32 %v532_v11, %v526_v55 }
 0x218   :  { %v547_v56 = vadd.f32 %v546_v41, %v545_v13  ;;  %837 = vset.pattern.permute.xlu0 %v873_v3  ;;  %834 = vset.pattern.permute.xlu2 %v873_v3  ;;  %v635_v13 = vperm.slane %v15_v22, 1 }
 0x219   :  { %833 = vset.pattern.permute.xlu1 %v874_v5  ;;  %618 = vperm.xlu0 %837, %v1145_v35  }
 0x21a   :  { %v549_v54 = vadd.f32 %v548_v26, %v547_v56  ;;  %662 = vperm.xlu2 %834, %v591_v21   ;;  %657 = vperm.xlu1 %833, %v591_v21  }
 0x21c   :  { %v597_v57 = vperm.slane %v549_v54, 0  ;;  %v603_v4 = vperm.slane %v549_v54, 1  ;;  %v609_v49 = vperm.slane %v549_v54, 2  ;;  %v615_v43 = vperm.slane %v549_v54, 3 }
 0x21d   :  { %v621_v62 = vperm.slane %v549_v54, 4  ;;  %v627_v12 = vperm.slane %v549_v54, 5 }
 0x21e   :  { %v598_v60 = vmul.f32 %v597_v57, %v595_v52  ;;  %v604_v61 = vmul.f32 %v603_v4, %v601_v45  ;;  %v610_v15 = vmul.f32 %v609_v49, %v607_v0 }
 0x220   :  { %v629_v63 = vadd.f32 %v604_v61, %v598_v60 }
 0x221   :  { %841 = vset.pattern.permute.xlu0 %v874_v5 }
 0x222   :  { %836 = vset.pattern.permute.xlu2 %v874_v5  ;;  %835 = vset.pattern.permute.xlu1 %v875_v6 }
 0x223   :  { %612 = vperm.xlu2 %836, %v1145_v35   ;;  %667 = vperm.xlu1 %835, %v591_v21  }
 0x22b   :  { %624 = vperm.xlu1 %835, %v1145_v35   ;;  %838 = vset.pattern.permute.xlu2 %v876_v9  ;;  %v636_v9 = vperm.slane %v15_v22, 2 }
 0x233   :  { %839 = vset.pattern.permute.xlu1 %v872_v2 }
 0x26a   :  { %v648_v59 = vpop.permute.xlu2 %647 }
 0x26b   :  { %v650_v25 = vmul.f32 %v648_v59, %v635_v13 }
 0x274   :  { %v663_v40 = vpop.permute.xlu2 %662 }
 0x275   :  { %v665_v28 = vmul.f32 %v663_v40, %v638_v16 }
 0x27d   :  { %v613_v17 = vpop.permute.xlu2 %612 }
 0x27e   :  { %v616_v58 = vmul.f32 %v615_v43, %v613_v17 }
 0x280   :  { %v630_v5 = vadd.f32 %v616_v58, %v610_v15 }
 0x282   :  { %v631_v7 = vadd.f32 %v630_v5, %v629_v63  ;;  %v653_v2 = vpop.permute.xlu0 %652 }
 0x283   :  { %v643_v8 = vpop.permute.xlu1 %642  ;;  %v655_v11 = vmul.f32 %v653_v2, %v636_v9 }
 0x284   :  { %v645_v19 = vmul.f32 %v643_v8, %v634_v18 }
 0x286   :  { %v671_v29 = vadd.f32 %v650_v25, %v645_v19 }
 0x28b   :  { %v619_v38 = vpop.permute.xlu0 %618 }
 0x28c   :  { %v658_v35 = vpop.permute.xlu1 %657  ;;  %v622_v39 = vmul.f32 %v621_v62, %v619_v38 }
 0x28d   :  { %v660_v14 = vmul.f32 %v658_v35, %v637_v10 }
 0x28f   :  { %v672_v26 = vadd.f32 %v660_v14, %v655_v11 }
 0x291   :  { %v673_v32 = vadd.f32 %v672_v26, %v671_v29 }
 0x295   :  { %v668_v27 = vpop.permute.xlu1 %667 }
 0x296   :  { %v670_v31 = vmul.f32 %v668_v27, %v639_v20 }
 0x298   :  { %v674_v33 = vadd.f32 %v670_v31, %v665_v28 }
 0x29a   :  { %v675_v23 = vadd.f32 %v674_v33, %v673_v32 }
 0x29c   :  { %696 = vperm.xlu0 %841, %v675_v23   ;;  %684 = vperm.xlu1 %839, %v675_v23  }
 0x29d   :  { %678 = vperm.xlu2 %838, %v675_v23   ;;  %v625_v30 = vpop.permute.xlu1 %624 }
 0x29e   :  { %v628_v42 = vmul.f32 %v627_v12, %v625_v30 }
 0x2a0   :  { %v632_v44 = vadd.f32 %v628_v42, %v622_v39 }
 0x2a2   :  { %v633_v46 = vadd.f32 %v632_v44, %v631_v7 }
 0x2a4   :  { %842 = vset.pattern.permute.xlu1 %v873_v3  ;;  %844 = vset.pattern.permute.xlu0 %v875_v6  ;;  %v699_v52 = vperm.slane %v633_v46, 3  ;;  %v687_v36 = vperm.slane %v633_v46, 1  ;;  %v681_v37 = vperm.slane %v633_v46, 0  ;;  %v693_v53 = vperm.slane %v633_v46, 2 }
 0x2a5   :  { %840 = vset.pattern.permute.xlu2 %v871_v1  ;;  %702 = vperm.xlu1 %842, %v675_v23   ;;  %v711_v41 = vperm.slane %v633_v46, 5  ;;  %v705_v54 = vperm.slane %v633_v46, 4 }
 0x2a6   :  { %690 = vperm.xlu2 %840, %v675_v23  }
 0x2ae   :  { %843 = vset.pattern.permute.xlu2 %v875_v6 }
 0x2af   :  { %708 = vperm.xlu2 %843, %v675_v23  }
 0x2f7   :  { %v679_v47 = vpop.permute.xlu2 %678 }
 0x2f8   :  { %v682_v3 = vmul.f32 %v681_v37, %v679_v47 }
 0x300   :  { %v691_v48 = vpop.permute.xlu2 %690 }
 0x301   :  { %v694_v24 = vmul.f32 %v693_v53, %v691_v48 }
 0x309   :  { %v709_v55 = vpop.permute.xlu2 %708 }
 0x30a   :  { %v712_v6 = vmul.f32 %v711_v41, %v709_v55 }
 0x30e   :  { %v685_v50 = vpop.permute.xlu1 %684  ;;  %v697_v51 = vpop.permute.xlu0 %696 }
 0x30f   :  { %v700_v21 = vmul.f32 %v699_v52, %v697_v51  ;;  %v688_v34 = vmul.f32 %v687_v36, %v685_v50 }
 0x311   :  { %v714_v1 = vadd.f32 %v700_v21, %v694_v24  ;;  %v713_v56 = vadd.f32 %v688_v34, %v682_v3 }
 0x313   :  { %v715_v45 = vadd.f32 %v714_v1, %v713_v56 }
 0x317   :  { %v703_v57 = vpop.permute.xlu1 %702 }
 0x318   :  { %v706_v4 = vmul.f32 %v705_v54, %v703_v57 }
 0x31a   :  { %v716_v60 = vadd.f32 %v712_v6, %v706_v4 }
 0x31c   :  { %v717_v61 = vadd.f32 %v716_v60, %v715_v45 }
 0x31e   :  { %719 = vst.msk [vmem:[#allocation2] sm:$0x3f] %vm718_vm0, %v717_v61 }
 0x31f   :  { %730 = dma.vmem_to_hbm [thread:$0]  %s726_s17, 128, %s728_s20, [#allocation3]  }
 0x320   :  { %869 = dma.done.wait [#allocation3], 128  }
 0x321   :  { %870 = vsyncadd [#allocation3], 4294967168 }
 0x322   :  { %735 = vsyncpa [#allocation3], 1 }

</bundles_post_ra>
